<compile_context>
chip_gen: v5e
topology: v5e:2x2
jax: 0.10.0
libtpu: 0.0.40
codegen_flags: <defaults>
</compile_context>

<pallas_src>
import math

import jax
import jax.numpy as jnp
from jax.experimental import pallas as pl
from jax.experimental.pallas import tpu as pltpu


# ---------------------------------------------------------------------------
# Kernel 1: conv stem (3x3 'same') + fused ReLU, one K-folded MXU matmul.
#
# The padded image is flattened per (n, cin) to a row of length Lpad with row
# stride W_pad; tap (kh, kw) is the contiguous window starting at
# kh*W_pad + kw.  The 9 tap windows are stacked along the contraction axis and
# contracted in a single GEMM:
#   out (Cout, H*W_pad) = w (Cout, 9*Cin) @ xk (9*Cin, H*W_pad)
# The output lane axis H*W_pad is a multiple of 128 (lane-dense stores) and is
# already channel-major (NCHW); columns w >= W of each row are padding.
# ---------------------------------------------------------------------------
def _make_conv_kernel(nb, w_pad, out_len, kh, kw):
    def kernel(x_ref, w_ref, o_ref):
        # x_ref: (Nb, Cin, Lpad) f32   w_ref: (Cout, KH*KW*Cin) f32
        # o_ref: (Nb, Cout, out_len) f32
        w = w_ref[...]
        for s in range(nb):                      # Nb kept small by _pick_conv_nb
            x_row = x_ref[s]                     # (Cin, Lpad)
            cols = []
            for r in range(kh):
                for c in range(kw):
                    shift = r * w_pad + c
                    # In-VMEM shifted view of the flattened padded frame.
                    # TODO(synk): if profiling shows Mosaic relayouts these
                    # lane-unaligned slices, switch to
                    #   pltpu.roll(x_row, Lpad - shift, axis=-1)[:, :out_len]
                    # (XLU rotate slot, otherwise idle here).
                    cols.append(x_row[:, shift:shift + out_len])
            xk = jnp.concatenate(cols, axis=0)   # (KH*KW*Cin, out_len)
            # Single K = KH*KW*Cin MXU pass (was 9 separate K=Cin passes).
            # f32 operands: lin_feat is a model output, keep it accurate.
            feat = jnp.dot(w, xk, preferred_element_type=jnp.float32)
            o_ref[s] = jnp.maximum(feat, 0.0)    # fused ReLU == relu(feat_map)

    return kernel


def _pick_conv_nb(n, bytes_per_sample, vmem_budget=8 << 20):
    """Samples per conv grid step: amortize the ~600-cycle per-step overhead,
    keep >= 2 grid steps so the 'parallel' axis still feeds both v7x cores,
    and stay well inside the v7x 32 MiB scoped-VMEM default."""
    target = max(1, n // 2)
    for nb in range(target, 0, -1):
        if n % nb == 0 and nb * bytes_per_sample <= vmem_budget:
            return nb
    return 1


def conv_stem(x_flat, w_packed, *, nb, w_pad, out_len, kh, kw):
    n, cin, lpad = x_flat.shape
    cout = w_packed.shape[0]
    return pl.pallas_call(
        _make_conv_kernel(nb, w_pad, out_len, kh, kw),
        out_shape=jax.ShapeDtypeStruct((n, cout, out_len), jnp.float32),
        grid=(n // nb,),
        in_specs=[
            pl.BlockSpec((nb, cin, lpad), lambda i: (i, 0, 0)),
            pl.BlockSpec((cout, kh * kw * cin), lambda i: (0, 0)),
        ],
        out_specs=pl.BlockSpec((nb, cout, out_len), lambda i: (i, 0, 0)),
        # TODO(synk): at real DenseNet channel counts, tile Cout / spatial and
        # set vmem_limit_bytes explicitly for v7x's 64 MiB VMEM.
        compiler_params=pltpu.CompilerParams(
            dimension_semantics=("parallel",)),  # independent per-sample tiles
    )(x_flat, w_packed)


# ---------------------------------------------------------------------------
# Kernel 2: WSOD head — Linear + softmax over the *padded* feature frame.
# Grid = (batch row tiles [parallel], F tiles [arbitrary reduction]) with an
# (Nb, C) f32 accumulator scratch (pl.when init/finalize).  fc_w arrives
# zero-padded + bf16 from the host; feature tile is cast to bf16 in-kernel.
# ---------------------------------------------------------------------------
def _head_kernel(f_ref, w_ref, b_ref, logit_ref, prob_ref, acc_ref):
    k = pl.program_id(1)

    @pl.when(k == 0)
    def _():
        acc_ref[...] = jnp.zeros_like(acc_ref)

    f = f_ref[...].astype(jnp.bfloat16)
    w = w_ref[...]  # already bf16 from the host (halved weight HBM stream)
    # logits partial: f (Nb, TK) @ w (C, TK)^T, contraction on dim 1 of both.
    acc_ref[...] += jax.lax.dot_general(
        f, w, dimension_numbers=(((1,), (1,)), ((), ())),
        preferred_element_type=jnp.float32)

    @pl.when(k == pl.num_programs(1) - 1)
    def _():
        logits = acc_ref[...] + b_ref[...]
        logit_ref[...] = logits
        m = jnp.max(logits, axis=-1, keepdims=True)
        e = jnp.exp(logits - m)
        # exact reciprocal keeps row-sums == 1 to f32 precision
        prob_ref[...] = e * pl.reciprocal(jnp.sum(e, axis=-1, keepdims=True))
        # NOTE: if num_classes grows, pad the output lane dim to 128 here
        # (slice on host) so these stores are unmasked vst.


def _pick_tk(f_dim, cap=8192):
    """Largest multiple-of-128 divisor of f_dim that is <= cap.  The caller
    pads f_dim to a multiple of 128, so 128 always divides and VMEM stays
    bounded even for awkward F."""
    start = min(cap, f_dim)
    start -= start % 128
    for tk in range(start, 0, -128):
        if f_dim % tk == 0:
            return tk
    return 128


def _pick_row_tile(n):
    """Batch rows per head tile: whole batch when tiny, otherwise a multiple
    of 8 dividing N so the leading 'parallel' axis has >1 step (v7x)."""
    if n <= 8 or n % 8 != 0:
        return n
    for rb in (128, 64, 32, 16, 8):
        if n % rb == 0:
            return rb
    return n


def wsod_head(feat2d, wfc_bf16, fc_b):
    n, f = feat2d.shape
    c = wfc_bf16.shape[0]
    # Guard: pad F to a multiple of 128 (zeros) so the K-tile search is bounded.
    f_pad = ((f + 127) // 128) * 128
    if f_pad != f:
        feat2d = jnp.pad(feat2d, ((0, 0), (0, f_pad - f)))
        wfc_bf16 = jnp.pad(wfc_bf16, ((0, 0), (0, f_pad - f)))
    tk = _pick_tk(f_pad)
    nb = _pick_row_tile(n)
    b2d = fc_b.reshape(1, c).astype(jnp.float32)
    return pl.pallas_call(
        _head_kernel,
        out_shape=(
            jax.ShapeDtypeStruct((n, c), jnp.float32),  # logits
            jax.ShapeDtypeStruct((n, c), jnp.float32),  # softmax probs
        ),
        grid=(n // nb, f_pad // tk),
        in_specs=[
            pl.BlockSpec((nb, tk), lambda i, k: (i, k)),
            pl.BlockSpec((c, tk), lambda i, k: (0, k)),
            pl.BlockSpec((1, c), lambda i, k: (0, 0)),
        ],
        out_specs=(
            pl.BlockSpec((nb, c), lambda i, k: (i, 0)),
            pl.BlockSpec((nb, c), lambda i, k: (i, 0)),
        ),
        scratch_shapes=[pltpu.VMEM((nb, c), jnp.float32)],
        compiler_params=pltpu.CompilerParams(
            dimension_semantics=("parallel", "arbitrary")),
    )(feat2d, wfc_bf16, b2d)


# ---------------------------------------------------------------------------
# Full forward.  Host glue is O(1x) passes: zero-embed into the padded frame,
# one-time weight reorders, and the mandatory lin_feat pad-column drop (model
# output).  The head reads the conv output in its padded frame directly; the
# corresponding fc_w pad columns are zeroed so padding cannot leak into logits.
# ---------------------------------------------------------------------------
def wsod_forward(img, conv_w, fc_w, fc_b):
    """img: (N, Cin, H, W) f32 NCHW.  conv_w: (Cout, Cin, 3, 3) stand-in stem.
    fc_w: (num_classes, Cout*H*W) (PyTorch Linear layout).  fc_b: (num_classes,).
    Returns (lin_feat, logits, probs) matching the torch module."""
    n, cin, h, w = img.shape
    cout, _, kh, kw = conv_w.shape
    num_classes = fc_w.shape[0]

    # padded-frame geometry: W_pad >= W + kw - 1 and H*W_pad % 128 == 0 so the
    # conv kernel's output lane axis is dense.
    step = 128 // math.gcd(h, 128)
    w_pad = ((w + kw - 1 + step - 1) // step) * step
    h_in = h + kh - 1
    out_len = h * w_pad
    lpad = ((h_in * w_pad + kw - 1 + 127) // 128) * 128

    # zero-embed the image ('same' padding); flatten (row stride = w_pad)
    x_sp = jnp.zeros((n, cin, h_in, w_pad), img.dtype)
    x_sp = x_sp.at[:, :, kh // 2:kh // 2 + h, kw // 2:kw // 2 + w].set(img)
    x_flat = x_sp.reshape(n, cin, h_in * w_pad)
    x_flat = jnp.pad(x_flat, ((0, 0), (0, 0), (0, lpad - h_in * w_pad)))

    # K-folded conv weights: column (kh*KW + kw)*Cin + cin  <->  stacked taps.
    w_packed = jnp.transpose(conv_w, (0, 2, 3, 1)).reshape(cout, kh * kw * cin)

    # conv grid coarsening (samples per step)
    per_sample = ((cin * lpad + cout * out_len) * 4 * 2
                  + 2 * kh * kw * cin * out_len * 4)
    nb_conv = _pick_conv_nb(n, per_sample)

    # --- conv stem + fused ReLU (Pallas) ---
    feat_pf = conv_stem(x_flat, w_packed, nb=nb_conv,
                        w_pad=w_pad, out_len=out_len, kh=kh, kw=kw)

    # model output: drop pad columns -> relu(feat_map).view(N, -1), NCHW order
    lin_feat = feat_pf.reshape(n, cout, h, w_pad)[:, :, :, :w]
    lin_feat = lin_feat.reshape(n, cout * h * w)

    # Head consumes the padded frame directly (free trailing-dim reshape, no
    # strided slice on the head path).  fc_w is scattered into the padded
    # frame with ZEROS in the pad columns (masks the cross-row contamination),
    # and streamed as bf16.
    feat2d = feat_pf.reshape(n, cout * out_len)
    wfc4 = fc_w.reshape(num_classes, cout, h, w)
    wfc_pad = jnp.zeros((num_classes, cout, h, w_pad), fc_w.dtype)
    wfc_pad = wfc_pad.at[:, :, :, :w].set(wfc4)
    wfc_pad = wfc_pad.reshape(num_classes, cout * out_len).astype(jnp.bfloat16)

    # --- classifier + softmax (Pallas, row-parallel x K-tiled reduction) ---
    logits, probs = wsod_head(feat2d, wfc_pad, fc_b)
    return lin_feat, logits, probs


if __name__ == "__main__":
    # Small, CIFAR-flavoured shapes.
    N, Cin, H, W = 2, 3, 16, 16
    Cout = 24                     # stand-in feature channels
    num_classes = 10
    in_features = Cout * H * W    # 6144

    key = jax.random.PRNGKey(0)
    k_img, k_conv, k_fcw, k_fcb = jax.random.split(key, 4)

    img = jax.random.normal(k_img, (N, Cin, H, W), dtype=jnp.float32)
    conv_w = 0.1 * jax.random.normal(k_conv, (Cout, Cin, 3, 3), dtype=jnp.float32)
    fc_w = 0.05 * jax.random.normal(k_fcw, (num_classes, in_features), dtype=jnp.float32)
    fc_b = 0.01 * jax.random.normal(k_fcb, (num_classes,), dtype=jnp.float32)

    lin_feat, logits, probs = jax.jit(wsod_forward)(img, conv_w, fc_w, fc_b)
    jax.block_until_ready((lin_feat, logits, probs))

    # ----- pure-JAX f32 reference -----
    feat_ref = jax.lax.conv_general_dilated(
        img, conv_w, window_strides=(1, 1), padding="SAME",
        dimension_numbers=("NCHW", "OIHW", "NCHW"))
    lin_ref = jnp.maximum(feat_ref, 0.0).reshape(N, -1)
    logits_ref = lin_ref @ fc_w.T + fc_b
    probs_ref = jax.nn.softmax(logits_ref, axis=-1)

    assert lin_feat.shape == (N, in_features)
    assert logits.shape == (N, num_classes)
    assert probs.shape == (N, num_classes)
    assert bool(jnp.allclose(jnp.sum(probs, axis=-1), 1.0, atol=1e-4))
    # f32 conv stem -> tight-ish; head uses bf16 weights -> looser logits/probs
    assert bool(jnp.allclose(lin_feat, lin_ref, atol=2e-2, rtol=2e-2))
    assert bool(jnp.allclose(logits, logits_ref, atol=1e-1, rtol=5e-2))
    assert bool(jnp.allclose(probs, probs_ref, atol=5e-2))

    print("KERNEL_OK")
</pallas_src>

<mosaic_0001>
module attributes {stable_mosaic.version = 11 : i64} {
  func.func @kernel(%arg0: i32, %arg1: memref<1x3x512xf32, #tpu.memory_space<vmem>>, %arg2: memref<24x27xf32, #tpu.memory_space<vmem>>, %arg3: memref<1x24x384xf32, #tpu.memory_space<vmem>>) attributes {dimension_semantics = [#tpu.dimension_semantics<parallel>], iteration_bounds = array<i64: 2>, scalar_prefetch = 0 : i64, scratch_operands = 0 : i64, tpu.core_type = #tpu.core_type<tc>, window_params = [{transform_indices = @transform_0, window_bounds = array<i64: 1, 3, 512>}, {pipeline_mode = #tpu.pipeline_mode<synchronous>, transform_indices = @transform_1, window_bounds = array<i64: 24, 27>}, {transform_indices = @transform_2, window_bounds = array<i64: 1, 24, 384>}]} {
    %c0 = arith.constant 0 : index
    %c0_0 = arith.constant 0 : index
    %0 = vector.load %arg2[%c0, %c0_0] : memref<24x27xf32, #tpu.memory_space<vmem>>, vector<24x27xf32>
    %c0_1 = arith.constant 0 : index
    %c0_2 = arith.constant 0 : index
    %c0_3 = arith.constant 0 : index
    %1 = vector.load %arg1[%c0_1, %c0_2, %c0_3] : memref<1x3x512xf32, #tpu.memory_space<vmem>>, vector<1x3x512xf32>
    %2 = vector.shape_cast %1 : vector<1x3x512xf32> to vector<3x512xf32>
    %3 = vector.extract_strided_slice %2 {offsets = [0, 0], sizes = [3, 384], strides = [1, 1]} : vector<3x512xf32> to vector<3x384xf32>
    %4 = vector.extract_strided_slice %2 {offsets = [0, 1], sizes = [3, 384], strides = [1, 1]} : vector<3x512xf32> to vector<3x384xf32>
    %5 = vector.extract_strided_slice %2 {offsets = [0, 2], sizes = [3, 384], strides = [1, 1]} : vector<3x512xf32> to vector<3x384xf32>
    %6 = vector.extract_strided_slice %2 {offsets = [0, 24], sizes = [3, 384], strides = [1, 1]} : vector<3x512xf32> to vector<3x384xf32>
    %7 = vector.extract_strided_slice %2 {offsets = [0, 25], sizes = [3, 384], strides = [1, 1]} : vector<3x512xf32> to vector<3x384xf32>
    %8 = vector.extract_strided_slice %2 {offsets = [0, 26], sizes = [3, 384], strides = [1, 1]} : vector<3x512xf32> to vector<3x384xf32>
    %9 = vector.extract_strided_slice %2 {offsets = [0, 48], sizes = [3, 384], strides = [1, 1]} : vector<3x512xf32> to vector<3x384xf32>
    %10 = vector.extract_strided_slice %2 {offsets = [0, 49], sizes = [3, 384], strides = [1, 1]} : vector<3x512xf32> to vector<3x384xf32>
    %11 = vector.extract_strided_slice %2 {offsets = [0, 50], sizes = [3, 384], strides = [1, 1]} : vector<3x512xf32> to vector<3x384xf32>
    %12 = tpu.concatenate %3, %4, %5, %6, %7, %8, %9, %10, %11 in 0 : vector<3x384xf32>, vector<3x384xf32>, vector<3x384xf32>, vector<3x384xf32>, vector<3x384xf32>, vector<3x384xf32>, vector<3x384xf32>, vector<3x384xf32>, vector<3x384xf32> -> vector<27x384xf32>
    %cst = arith.constant dense<0.000000e+00> : vector<24x384xf32>
    %13 = tpu.matmul %0, %12, %cst {dimension_numbers = #tpu.dot_dimension_numbers<[1], [0], [0], [1], [0, 0, 1, 1], [], []>} : vector<24x27xf32>, vector<27x384xf32>, vector<24x384xf32> -> vector<24x384xf32>
    %cst_4 = arith.constant 0.000000e+00 : f32
    %14 = vector.broadcast %cst_4 : f32 to vector<24x384xf32>
    %15 = arith.maximumf %13, %14 : vector<24x384xf32>
    %c0_5 = arith.constant 0 : index
    %c0_6 = arith.constant 0 : index
    %c0_7 = arith.constant 0 : index
    %16 = vector.load %arg3[%c0_5, %c0_6, %c0_7] : memref<1x24x384xf32, #tpu.memory_space<vmem>>, vector<1x24x384xf32>
    %17 = vector.shape_cast %16 : vector<1x24x384xf32> to vector<24x384xf32>
    %18 = vector.shape_cast %15 : vector<24x384xf32> to vector<1x24x384xf32>
    tpu.vector_store %arg3[%c0_5, %c0_6, %c0_7], %18 {strides = array<i32>} : memref<1x24x384xf32, #tpu.memory_space<vmem>>, vector<1x24x384xf32>,
    return
  }
  func.func @transform_0(%arg0: i32) -> (i32, i32, i32) {
    %c0_i32 = arith.constant 0 : i32
    %c0_i32_0 = arith.constant 0 : i32
    %c0_i32_1 = arith.constant 0 : i32
    return %arg0, %c0_i32, %c0_i32_0 : i32, i32, i32
  }
  func.func @transform_1(%arg0: i32) -> (i32, i32) {
    %c0_i32 = arith.constant 0 : i32
    %c0_i32_0 = arith.constant 0 : i32
    %c0_i32_1 = arith.constant 0 : i32
    return %c0_i32, %c0_i32_0 : i32, i32
  }
  func.func @transform_2(%arg0: i32) -> (i32, i32, i32) {
    %c0_i32 = arith.constant 0 : i32
    %c0_i32_0 = arith.constant 0 : i32
    %c0_i32_1 = arith.constant 0 : i32
    return %arg0, %c0_i32, %c0_i32_0 : i32, i32, i32
  }
}

module attributes {stable_mosaic.version = 11 : i64} {
  func.func @_head_kernel(%arg0: i32, %arg1: i32, %arg2: memref<2x4608xf32, #tpu.memory_space<vmem>>, %arg3: memref<10x4608xbf16, #tpu.memory_space<vmem>>, %arg4: memref<1x10xf32, #tpu.memory_space<vmem>>, %arg5: memref<2x10xf32, #tpu.memory_space<vmem>>, %arg6: memref<2x10xf32, #tpu.memory_space<vmem>>, %arg7: memref<2x10xf32, #tpu.memory_space<vmem>>) attributes {dimension_semantics = [#tpu.dimension_semantics<parallel>, #tpu.dimension_semantics<arbitrary>], iteration_bounds = array<i64: 1, 2>, scalar_prefetch = 0 : i64, scratch_operands = 1 : i64, tpu.core_type = #tpu.core_type<tc>, window_params = [{transform_indices = @transform_0, window_bounds = array<i64: 2, 4608>}, {transform_indices = @transform_1, window_bounds = array<i64: 10, 4608>}, {pipeline_mode = #tpu.pipeline_mode<synchronous>, transform_indices = @transform_2, window_bounds = array<i64: 1, 10>}, {transform_indices = @transform_3, window_bounds = array<i64: 2, 10>}, {transform_indices = @transform_4, window_bounds = array<i64: 2, 10>}]} {
    %c0_i32 = arith.constant 0 : i32
    %0 = arith.cmpi eq, %arg1, %c0_i32 : i32
    %1 = arith.extui %0 : i1 to i32
    %c0_i32_0 = arith.constant 0 : i32
    %2 = arith.cmpi ne, %1, %c0_i32_0 : i32
    scf.if %2 {
      %cst_9 = arith.constant 0.000000e+00 : f32
      %13 = vector.broadcast %cst_9 : f32 to vector<2x10xf32>
      %c0_10 = arith.constant 0 : index
      %c0_11 = arith.constant 0 : index
      %14 = vector.load %arg7[%c0_10, %c0_11] : memref<2x10xf32, #tpu.memory_space<vmem>>, vector<2x10xf32>
      tpu.vector_store %arg7[%c0_10, %c0_11], %13 {strides = array<i32>} : memref<2x10xf32, #tpu.memory_space<vmem>>, vector<2x10xf32>,
    } else {
    }
    %c0 = arith.constant 0 : index
    %c0_1 = arith.constant 0 : index
    %3 = vector.load %arg2[%c0, %c0_1] : memref<2x4608xf32, #tpu.memory_space<vmem>>, vector<2x4608xf32>
    %4 = arith.truncf %3 : vector<2x4608xf32> to vector<2x4608xbf16>
    %c0_2 = arith.constant 0 : index
    %c0_3 = arith.constant 0 : index
    %5 = vector.load %arg3[%c0_2, %c0_3] : memref<10x4608xbf16, #tpu.memory_space<vmem>>, vector<10x4608xbf16>
    %c0_4 = arith.constant 0 : index
    %c0_5 = arith.constant 0 : index
    %6 = vector.load %arg7[%c0_4, %c0_5] : memref<2x10xf32, #tpu.memory_space<vmem>>, vector<2x10xf32>
    %cst = arith.constant dense<0.000000e+00> : vector<2x10xf32>
    %7 = tpu.matmul %4, %5, %cst {dimension_numbers = #tpu.dot_dimension_numbers<[1], [1], [0], [0], [0, 0, 1, 0], [], []>} : vector<2x4608xbf16>, vector<10x4608xbf16>, vector<2x10xf32> -> vector<2x10xf32>
    %8 = arith.addf %6, %7 : vector<2x10xf32>
    %c0_6 = arith.constant 0 : index
    %c0_7 = arith.constant 0 : index
    %9 = vector.load %arg7[%c0_6, %c0_7] : memref<2x10xf32, #tpu.memory_space<vmem>>, vector<2x10xf32>
    tpu.vector_store %arg7[%c0_6, %c0_7], %8 {strides = array<i32>} : memref<2x10xf32, #tpu.memory_space<vmem>>, vector<2x10xf32>,
    %c1_i32 = arith.constant 1 : i32
    %10 = arith.cmpi eq, %arg1, %c1_i32 : i32
    %11 = arith.extui %10 : i1 to i32
    %c0_i32_8 = arith.constant 0 : i32
    %12 = arith.cmpi ne, %11, %c0_i32_8 : i32
    scf.if %12 {
      %c0_9 = arith.constant 0 : index
      %c0_10 = arith.constant 0 : index
      %13 = vector.load %arg7[%c0_9, %c0_10] : memref<2x10xf32, #tpu.memory_space<vmem>>, vector<2x10xf32>
      %c0_11 = arith.constant 0 : index
      %c0_12 = arith.constant 0 : index
      %14 = vector.load %arg4[%c0_11, %c0_12] : memref<1x10xf32, #tpu.memory_space<vmem>>, vector<1x10xf32>
      %15 = vector.broadcast %14 : vector<1x10xf32> to vector<2x10xf32>
      %16 = arith.addf %13, %15 : vector<2x10xf32>
      %c0_13 = arith.constant 0 : index
      %c0_14 = arith.constant 0 : index
      %17 = vector.load %arg5[%c0_13, %c0_14] : memref<2x10xf32, #tpu.memory_space<vmem>>, vector<2x10xf32>
      tpu.vector_store %arg5[%c0_13, %c0_14], %16 {strides = array<i32>} : memref<2x10xf32, #tpu.memory_space<vmem>>, vector<2x10xf32>,
      %cst_15 = arith.constant dense<0xFF800000> : vector<2xf32>
      %18 = vector.multi_reduction <maximumf>, %16, %cst_15 [1] : vector<2x10xf32> to vector<2xf32>
      %19 = vector.shape_cast %18 : vector<2xf32> to vector<2x1xf32>
      %20 = vector.broadcast %19 : vector<2x1xf32> to vector<2x10xf32>
      %21 = arith.subf %16, %20 : vector<2x10xf32>
      %22 = math.exp %21 : vector<2x10xf32>
      %cst_16 = arith.constant dense<0.000000e+00> : vector<2xf32>
      %23 = vector.multi_reduction <add>, %22, %cst_16 [1] : vector<2x10xf32> to vector<2xf32>
      %24 = vector.shape_cast %23 : vector<2xf32> to vector<2x1xf32>
      %25 = tpu.reciprocal %24 : vector<2x1xf32> -> vector<2x1xf32>
      %26 = vector.broadcast %25 : vector<2x1xf32> to vector<2x10xf32>
      %27 = arith.mulf %22, %26 : vector<2x10xf32>
      %c0_17 = arith.constant 0 : index
      %c0_18 = arith.constant 0 : index
      %28 = vector.load %arg6[%c0_17, %c0_18] : memref<2x10xf32, #tpu.memory_space<vmem>>, vector<2x10xf32>
      tpu.vector_store %arg6[%c0_17, %c0_18], %27 {strides = array<i32>} : memref<2x10xf32, #tpu.memory_space<vmem>>, vector<2x10xf32>,
    } else {
    }
    return
  }
  func.func @transform_0(%arg0: i32, %arg1: i32) -> (i32, i32) {
    %c0_i32 = arith.constant 0 : i32
    return %arg0, %arg1 : i32, i32
  }
  func.func @transform_1(%arg0: i32, %arg1: i32) -> (i32, i32) {
    %c0_i32 = arith.constant 0 : i32
    %c0_i32_0 = arith.constant 0 : i32
    return %c0_i32, %arg1 : i32, i32
  }
  func.func @transform_2(%arg0: i32, %arg1: i32) -> (i32, i32) {
    %c0_i32 = arith.constant 0 : i32
    %c0_i32_0 = arith.constant 0 : i32
    %c0_i32_1 = arith.constant 0 : i32
    return %c0_i32, %c0_i32_0 : i32, i32
  }
  func.func @transform_3(%arg0: i32, %arg1: i32) -> (i32, i32) {
    %c0_i32 = arith.constant 0 : i32
    %c0_i32_0 = arith.constant 0 : i32
    return %arg0, %c0_i32 : i32, i32
  }
  func.func @transform_4(%arg0: i32, %arg1: i32) -> (i32, i32) {
    %c0_i32 = arith.constant 0 : i32
    %c0_i32_0 = arith.constant 0 : i32
    return %arg0, %c0_i32 : i32, i32
  }
}

</mosaic_0001>

<bundles_post_ra>
// kernel: wsod_forward.2
= control target key start
LH: loop header
LB: loop body
LE: loop exit
PB: predicated region body
PF: predicated region fallthrough
CT: control target
= control target key end

     0   :  { %s698_s9 = smov 0   ;;  %s885_s0 = inlined_call_operand.vmem [shape: f32[2,3,512], index: 0, kind: input, shape index: {}]   ;;  %s886_s1 = inlined_call_operand.vmem [shape: f32[24,27], index: 1, kind: input, shape index: {}]   ;;  %s887_s2 = inlined_call_operand.vmem [shape: f32[2,24,384], index: 2, kind: output, shape index: {}]  }
   0x1 LB: > { %s553_s10 = sadd.s32 4294967295, %s673_s9   ;;  %p557_p0 = scmp.ge.s32.totalorder %s673_s9, 1  ;;  %s673_s9 = sphi %s698_s9, %s12_s9  }
   0x2   : > { %p112_p1 = scmp.lt.s32.totalorder %s673_s9, 3 }
   0x4   : > { %p113_p2 = pnand %p557_p0, %p112_p1 }
   0x5   : > { %p134_p3 = scmp.lt.s32.totalorder (!%p113_p2), %s553_s10, 1  ;;  %s675_s15 = smov (!%p113_p2), 127  }
   0x6   : > { %116 = sbr.rel (%p113_p2) target bundleno = 371 (0x173), region = 28  ;;  %s676_s16 = smov (!%p113_p2), 126  }
   0x7   : > { %s677_s17 = smov (!%p113_p2), 104   ;;  %s678_s18 = smov (!%p113_p2), 103  }
   0x8   : > { %s679_s19 = smov (!%p113_p2), 102   ;;  %s680_s20 = smov (!%p113_p2), 80  }
   0x9   : > { %s681_s21 = smov (!%p113_p2), 79   ;;  %s682_s22 = smov (!%p113_p2), 78  }
   0xb   : > { %s889_s10 = smov (!%p134_p3, %s553_s10), 1  ;;  %vm179_vm0 = vcmask 1039360   ;;  %vm205_vm1 = vcmask 1031168   ;;  %vm231_vm2 = vcmask 850944   ;;  %vm354_vm3 = vcmask 637952  }
   0xc   : > { %s575_s11 = sshll.u32 %s889_s10, 4  ;;  %vm366_vm4 = vcmask 1040384   ;;  %vm358_vm5 = vcmask 1042432   ;;  %vm254_vm6 = vcmask 842752   ;;  %vm280_vm7 = vcmask 834560   ;;  %s580_s29 = smul.u32 72, %s889_s10 }
   0xd   : > { %s138_s14 = scalar_lea.vmem %s885_s0, %s575_s11  ;;  %vm370_vm8 = vcmask 1043456   ;;  %vm306_vm9 = vcmask 654336   ;;  %vm332_vm10 = vcmask 646144   ;;  %vm378_vm11 = vcmask 1041408  }
   0xe   : > { %v712_v0 = vld [vmem:[%s138_s14 + $0x8] sm:$0x77]  ;;  %v714_v1 = vld [vmem:[%s138_s14] sm:$0x77]  ;;  %vm382_vm12 = vcmask 1044480   ;;  %vm374_vm13 = vcmask 1046528   ;;  %s143_s4 = scalar_lea.vmem %s887_s2, %s580_s29 }
   0xf   : > { %153 = vst [vmem:[#allocation1 + $0x10] ss:$2 sm:$0xff] %v712_v0  ;;  %vm362_vm14 = vcmask 1045504   ;;  %vm386_vm15 = vcmask 220160  }
  0x10   : > { %151 = vst [vmem:[#allocation1] ss:$2 sm:$0xff] %v714_v1 }
  0x16   : > { %v718_v2 = vld.sshfl [vmem:[#allocation1 + $0x10] sm:$0xff pattern:$0x75316420] }
  0x17   : > { %162 = vst [vmem:[#allocation1 + $0x10] ss:$2 sm:$0xff] %v712_v0  ;;  %v721_v3 = vld.sshfl [vmem:[#allocation1] sm:$0xff pattern:$0x75316420] }
  0x18   : > { %v723_v4 = vld.sshfl [vmem:[#allocation1 + $0x8] sm:$0xff pattern:$0x75316420] }
  0x19   : > { %160 = vst [vmem:[#allocation1] ss:$2 sm:$0xff] %v714_v1 }
  0x1e   : > { %v165_v5 = vld.sshfl [vmem:[#allocation1 + $0x10] sm:$0xff pattern:$0x75316420]  ;;  %v166_v6 = vld.sshfl [vmem:[#allocation1 + $0x18] sm:$0xff pattern:$0x75316420] }
  0x1f   : > { %v169_v7 = vrot.slane %v165_v5, 5  ;;  %v170_v8 = vrot.slane %v166_v6, 5  ;;  %188 = vst [vmem:[#allocation1 + $0x10] ss:$2 sm:$0xff] %v712_v0 }
  0x20   : > { %v163_v9 = vld.sshfl [vmem:[#allocation1] sm:$0xff pattern:$0x75316420]  ;;  %v164_v10 = vld.sshfl [vmem:[#allocation1 + $0x8] sm:$0xff pattern:$0x75316420] }
  0x21   : > { %v597_v11 = vpack.i.bf16 %v170_v8, %v169_v7  ;;  %186 = vst [vmem:[#allocation1] ss:$2 sm:$0xff] %v714_v1  ;;  %v167_v44 = vrot.slane %v163_v9, 5  ;;  %v168_v45 = vrot.slane %v164_v10, 5 }
  0x23   : > { %598 = vrot.lane.b32.xlu2 %v597_v11, %s675_s15  ;;  %v662_v48 = vpack.i.bf16 %v167_v44, %v168_v45 }
  0x26   : > { %v191_v12 = vld.sshfl [vmem:[#allocation1 + $0x10] sm:$0xff pattern:$0x75316420]  ;;  %v192_v13 = vld.sshfl [vmem:[#allocation1 + $0x18] sm:$0xff pattern:$0x75316420] }
  0x27   : > { %v195_v14 = vrot.slane %v191_v12, 2  ;;  %v196_v15 = vrot.slane %v192_v13, 2  ;;  %214 = vst [vmem:[#allocation1 + $0x10] ss:$2 sm:$0xff] %v712_v0 }
  0x28   : > { %v189_v16 = vld.sshfl [vmem:[#allocation1] sm:$0xff pattern:$0x75316420]  ;;  %v190_v17 = vld.sshfl [vmem:[#allocation1 + $0x8] sm:$0xff pattern:$0x75316420] }
  0x29   : > { %v193_v18 = vrot.slane %v189_v16, 2  ;;  %v194_v19 = vrot.slane %v190_v17, 2  ;;  %212 = vst [vmem:[#allocation1] ss:$2 sm:$0xff] %v714_v1  ;;  %v602_v20 = vpack.i.bf16 %v196_v15, %v195_v14 }
  0x2b   : > { %v607_v21 = vpack.i.bf16 %v193_v18, %v194_v19  ;;  %603 = vrot.lane.b32.xlu2 %v602_v20, %s676_s16 }
  0x2d   : > { %608 = vrot.lane.b32.xlu0 %v607_v21, %s676_s16 }
  0x2e   : > { %v217_v22 = vld.sshfl [vmem:[#allocation1 + $0x10] sm:$0xff pattern:$0x75316420]  ;;  %v218_v23 = vld.sshfl [vmem:[#allocation1 + $0x18] sm:$0xff pattern:$0x75316420] }
  0x2f   : > { %241 = vst [vmem:[#allocation1 + $0x11] ss:$2 sm:$0xff] %v712_v0  ;;  %v221_v24 = vrot.slane %v217_v22, 7  ;;  %v222_v25 = vrot.slane %v218_v23, 7 }
  0x30   : > { %v215_v26 = vld.sshfl [vmem:[#allocation1] sm:$0xff pattern:$0x75316420]  ;;  %v216_v27 = vld.sshfl [vmem:[#allocation1 + $0x8] sm:$0xff pattern:$0x75316420] }
  0x31   : > { %v219_v28 = vrot.slane %v215_v26, 7  ;;  %v220_v29 = vrot.slane %v216_v27, 7  ;;  %239 = vst [vmem:[#allocation1 + $0x1] ss:$2 sm:$0xff] %v714_v1  ;;  %v612_v30 = vpack.i.bf16 %v222_v25, %v221_v24 }
  0x33   : > { %v617_v31 = vpack.i.bf16 %v219_v28, %v220_v29  ;;  %613 = vrot.lane.b32.xlu2 %v612_v30, %s677_s17 }
  0x35   : > { %618 = vrot.lane.b32.xlu1 %v617_v31, %s677_s17 }
  0x36   : > { %v244_v32 = vld.sshfl [vmem:[#allocation1 + $0x10] sm:$0xff pattern:$0x75316420]  ;;  %v245_v33 = vld.sshfl [vmem:[#allocation1 + $0x18] sm:$0xff pattern:$0x75316420] }
  0x37   : > { %263 = vst [vmem:[#allocation1 + $0x10] ss:$2 sm:$0xff] %v712_v0  ;;  %v622_v36 = vpack.i.bf16 %v245_v33, %v244_v32 }
  0x38   : > { %v242_v34 = vld.sshfl [vmem:[#allocation1] sm:$0xff pattern:$0x75316420]  ;;  %v243_v35 = vld.sshfl [vmem:[#allocation1 + $0x8] sm:$0xff pattern:$0x75316420] }
  0x39   : > { %261 = vst [vmem:[#allocation1] ss:$2 sm:$0xff] %v714_v1 }
  0x3d   : > { %623 = vrot.lane.b32.xlu1 %v622_v36, %s678_s18 }
  0x3e   : > { %v266_v37 = vld.sshfl [vmem:[#allocation1 + $0x10] sm:$0xff pattern:$0x75316420]  ;;  %v267_v38 = vld.sshfl [vmem:[#allocation1 + $0x18] sm:$0xff pattern:$0x75316420] }
  0x3f   : > { %v270_v39 = vrot.slane %v266_v37, 1  ;;  %v271_v40 = vrot.slane %v267_v38, 1  ;;  %289 = vst [vmem:[#allocation1 + $0x10] ss:$2 sm:$0xff] %v712_v0 }
  0x40   : > { %v264_v41 = vld.sshfl [vmem:[#allocation1] sm:$0xff pattern:$0x75316420]  ;;  %v265_v42 = vld.sshfl [vmem:[#allocation1 + $0x8] sm:$0xff pattern:$0x75316420] }
  0x41   : > { %v627_v43 = vpack.i.bf16 %v271_v40, %v270_v39  ;;  %287 = vst [vmem:[#allocation1] ss:$2 sm:$0xff] %v714_v1  ;;  %v268_v46 = vrot.slane %v264_v41, 1  ;;  %v269_v47 = vrot.slane %v265_v42, 1 }
  0x43   : > { %628 = vrot.lane.b32.xlu0 %v627_v43, %s679_s19  ;;  %v632_v51 = vpack.i.bf16 %v268_v46, %v269_v47 }
  0x46   : > { %v292_v49 = vld.sshfl [vmem:[#allocation1 + $0x10] sm:$0xff pattern:$0x75316420]  ;;  %v293_v50 = vld.sshfl [vmem:[#allocation1 + $0x18] sm:$0xff pattern:$0x75316420] }
  0x47   : > { %315 = vst [vmem:[#allocation1 + $0x10] ss:$2 sm:$0xff] %v712_v0  ;;  %v296_v57 = vrot.slane %v292_v49, 6  ;;  %v297_v58 = vrot.slane %v293_v50, 6 }
  0x48   : > { %v290_v52 = vld.sshfl [vmem:[#allocation1] sm:$0xff pattern:$0x75316420]  ;;  %v291_v53 = vld.sshfl [vmem:[#allocation1 + $0x8] sm:$0xff pattern:$0x75316420] }
  0x49   : > { %v294_v54 = vrot.slane %v290_v52, 6  ;;  %v295_v55 = vrot.slane %v291_v53, 6  ;;  %313 = vst [vmem:[#allocation1] ss:$2 sm:$0xff] %v714_v1  ;;  %v637_v61 = vpack.i.bf16 %v297_v58, %v296_v57 }
  0x4b   : > { %633 = vrot.lane.b32.xlu0 %v632_v51, %s679_s19  ;;  %v642_v56 = vpack.i.bf16 %v294_v54, %v295_v55 }
  0x4d   : > { %643 = vrot.lane.b32.xlu1 %v642_v56, %s680_s20 }
  0x4e   : > { %v318_v59 = vld.sshfl [vmem:[#allocation1 + $0x10] sm:$0xff pattern:$0x75316420]  ;;  %v319_v60 = vld.sshfl [vmem:[#allocation1 + $0x18] sm:$0xff pattern:$0x75316420] }
  0x4f   : > { %341 = vst [vmem:[#allocation1 + $0x10] ss:$2 sm:$0xff] %v712_v0  ;;  %v322_v8 = vrot.slane %v318_v59, 3  ;;  %v323_v9 = vrot.slane %v319_v60, 3  ;;  %v657_v0 = vpack.i.bf16 %v242_v34, %v243_v35 }
  0x50   : > { %v316_v62 = vld.sshfl [vmem:[#allocation1] sm:$0xff pattern:$0x75316420]  ;;  %v317_v63 = vld.sshfl [vmem:[#allocation1 + $0x8] sm:$0xff pattern:$0x75316420] }
  0x51   : > { %v320_v5 = vrot.slane %v316_v62, 3  ;;  %v321_v6 = vrot.slane %v317_v63, 3  ;;  %339 = vst [vmem:[#allocation1] ss:$2 sm:$0xff] %v714_v1  ;;  %v647_v11 = vpack.i.bf16 %v323_v9, %v322_v8 }
  0x53   : > { %v652_v7 = vpack.i.bf16 %v320_v5, %v321_v6  ;;  %638 = vrot.lane.b32.xlu0 %v637_v61, %s680_s20 }
  0x55   : > { %653 = vrot.lane.b32.xlu2 %v652_v7, %s681_s21 }
  0x56   : > { %v344_v10 = vld.sshfl [vmem:[#allocation1 + $0x10] sm:$0xff pattern:$0x75316420]  ;;  %v345_v13 = vld.sshfl [vmem:[#allocation1 + $0x18] sm:$0xff pattern:$0x75316420] }
  0x57   : > { %350 = vrot.lane.b32.xlu1 %v344_v10, %s682_s22 }
  0x58   : > { %v343_v12 = vld.sshfl [vmem:[#allocation1 + $0x8] sm:$0xff pattern:$0x75316420]  ;;  %v342_v14 = vld.sshfl [vmem:[#allocation1] sm:$0xff pattern:$0x75316420] }
  0x5b   : > { %648 = vrot.lane.b32.xlu0 %v647_v11, %s681_s21 }
  0x5d   : > { %348 = vrot.lane.b32.xlu2 %v343_v12, %s682_s22 }
  0x5f   : > { %352 = vrot.lane.b32.xlu1 %v345_v13, %s682_s22 }
  0x63   : > { %658 = vrot.lane.b32.xlu0 %v657_v0, %s678_s18 }
  0x65   : > { %663 = vrot.lane.b32.xlu2 %v662_v48, %s675_s15 }
  0x67   : > { %346 = vrot.lane.b32.xlu1 %v342_v14, %s682_s22 }
  0x7d   : > { %v744_v1 = vpop.permute.xlu2 %598 }
  0x7e   : > { %v601_v26 = vunpack.i.h.bf16 %v744_v1  ;;  %v600_v27 = vunpack.i.l.bf16 %v744_v1 }
  0x80   : > { %v182_v36 = vsel %vm179_vm0, %v600_v27, %v601_v26 }
  0x81   : > { %v361_v12 = vsel %vm358_vm5, %v718_v2, %v182_v36 }
  0x85   : > { %v746_v15 = vpop.permute.xlu2 %603 }
  0x86   : > { %v606_v24 = vunpack.i.h.bf16 %v746_v15  ;;  %v605_v29 = vunpack.i.l.bf16 %v746_v15 }
  0x88   : > { %v775_v32 = vsel %vm205_vm1, %v605_v29, %v606_v24 }
  0x8d   : > { %v752_v18 = vpop.permute.xlu2 %613 }
  0x8e   : > { %v616_v25 = vunpack.i.h.bf16 %v752_v18  ;;  %v615_v30 = vunpack.i.l.bf16 %v752_v18 }
  0x90   : > { %v234_v33 = vsel %vm231_vm2, %v615_v30, %v616_v25 }
  0x91   : > { %v369_v42 = vsel %vm366_vm4, %v775_v32, %v234_v33 }
  0x9f   : > { %v748_v16 = vpop.permute.xlu0 %608 }
  0xa0   : > { %v611_v43 = vunpack.i.h.bf16 %v748_v16  ;;  %v610_v44 = vunpack.i.l.bf16 %v748_v16 }
  0xa2   : > { %v206_v13 = vsel %vm205_vm1, %v611_v43, %v610_v44  ;;  %v207_v0 = vsel %vm205_vm1, %v610_v44, %v605_v29 }
  0xa7   : > { %v750_v17 = vpop.permute.xlu1 %618 }
  0xa8   : > { %v621_v54 = vunpack.i.h.bf16 %v750_v17  ;;  %v620_v56 = vunpack.i.l.bf16 %v750_v17 }
  0xaa   : > { %v232_v14 = vsel %vm231_vm2, %v621_v54, %v620_v56 }
  0xaf   : > { %v756_v20 = vpop.permute.xlu1 %623  ;;  %v758_v21 = vpop.permute.xlu2 %653 }
  0xb0   : > { %v626_v37 = vunpack.i.h.bf16 %v756_v20  ;;  %v625_v38 = vunpack.i.l.bf16 %v756_v20  ;;  %v655_v46 = vunpack.i.l.bf16 %v758_v21  ;;  %v656_v17 = vunpack.i.h.bf16 %v758_v21  ;;  %v144_v21 = vld [vmem:[%s886_s1] sm:$0xff] }
  0xb2   : > { %v257_v53 = vsel %vm254_vm6, %v625_v38, %v626_v37  ;;  %v333_v36 = vsel %vm332_vm10, %v656_v17, %v655_v46 }
  0xb3   : > { %v373_v5 = vsel %vm370_vm8, %v369_v42, %v257_v53  ;;  %v145_v42 = vld [vmem:[%s886_s1 + $0x8] sm:$0xff] }
  0xb5   : > { %v754_v19 = vpop.permute.xlu0 %628 }
  0xb6   : > { %v630_v47 = vunpack.i.l.bf16 %v754_v19  ;;  %v631_v50 = vunpack.i.h.bf16 %v754_v19  ;;  %v233_v19 = vsel %vm231_vm2, %v620_v56, %v615_v30 }
  0xb7   : > { %v770_v31 = vpop.permute.xlu2 %348  ;;  %v368_v30 = vsel %vm366_vm4, %v207_v0, %v233_v19 }
  0xb8   : > { %v283_v9 = vsel %vm280_vm7, %v630_v47, %v631_v50 }
  0xb9   : > { %v377_v2 = vsel %vm374_vm13, %v373_v5, %v283_v9 }
  0xbd   : > { %v760_v22 = vpop.permute.xlu0 %633 }
  0xbe   : > { %v635_v40 = vunpack.i.l.bf16 %v760_v22  ;;  %v636_v6 = vunpack.i.h.bf16 %v760_v22 }
  0xbf   : > { %v762_v23 = vpop.permute.xlu1 %643  ;;  %v664_v57 = vpop.permute.xlu2 %663 }
  0xc0   : > { %v645_v41 = vunpack.i.l.bf16 %v762_v23  ;;  %v282_v55 = vsel %vm280_vm7, %v635_v40, %v630_v47  ;;  %v646_v7 = vunpack.i.h.bf16 %v762_v23  ;;  %v665_v10 = vunpack.i.l.bf16 %v664_v57 }
  0xc1   : > { %v666_v22 = vunpack.i.h.bf16 %v664_v57  ;;  %v281_v15 = vsel %vm280_vm7, %v636_v6, %v635_v40 }
  0xc2   : > { %v307_v26 = vsel %vm306_vm9, %v646_v7, %v645_v41  ;;  %v181_v18 = vsel %vm179_vm0, %v665_v10, %v600_v27  ;;  %v367_v27 = vsel %vm366_vm4, %v206_v13, %v232_v14 }
  0xc3   : > { %v379_v1 = vsel %vm378_vm11, %v281_v15, %v307_v26  ;;  %v360_v37 = vsel %vm358_vm5, %v723_v4, %v181_v18 }
  0xc4   : > { %v383_v40 = vsel %vm382_vm12, %v379_v1, %v333_v36 }
  0xc5   : > { %v639_v28 = vpop.permute.xlu0 %638 }
  0xc6   : > { %v640_v34 = vunpack.i.l.bf16 %v639_v28  ;;  %v641_v45 = vunpack.i.h.bf16 %v639_v28  ;;  %v365_v28 = vsel %vm362_vm14, %v361_v12, %v775_v32 }
  0xc8   : > { %v308_v49 = vsel %vm306_vm9, %v645_v41, %v640_v34  ;;  %v309_v60 = vsel %vm306_vm9, %v640_v34, %v641_v45 }
  0xc9   : > { %v351_v35 = vpop.permute.xlu1 %350  ;;  %v380_v59 = vsel %vm378_vm11, %v282_v55, %v308_v49  ;;  %v381_v11 = vsel %vm378_vm11, %v283_v9, %v309_v60 }
  0xca   : > { %v356_v39 = vsel %vm354_vm3, %v770_v31, %v351_v35 }
  0xcb   : > { %565 = vmatpush.msk.msra.mxu1 %vm358_vm5, %v356_v39 }
  0xcd   : > { %v649_v48 = vpop.permute.xlu0 %648 }
  0xce   : > { %v651_v51 = vunpack.i.h.bf16 %v649_v48  ;;  %v650_v52 = vunpack.i.l.bf16 %v649_v48 }
  0xd0   : > { %v334_v58 = vsel %vm332_vm10, %v655_v46, %v650_v52  ;;  %v335_v63 = vsel %vm332_vm10, %v650_v52, %v651_v51 }
  0xd1   : > { %v353_v61 = vpop.permute.xlu1 %352  ;;  %v384_v62 = vsel %vm382_vm12, %v380_v59, %v334_v58  ;;  %v385_v16 = vsel %vm382_vm12, %v381_v11, %v335_v63 }
  0xd2   : > { %441 = vmatpush.msra.mxu1 %v384_v62  ;;  %v357_v8 = vsel %vm354_vm3, %v351_v35, %v353_v61 }
  0xd3   : > { %569 = vmatpush.msk.msra.mxu2 %vm358_vm5, %v357_v8 }
  0xd5   : > { %v659_v23 = vpop.permute.xlu0 %658  ;;  %467 = vmatpush.msra.mxu2 %v385_v16 }
  0xd6   : > { %v661_v24 = vunpack.i.h.bf16 %v659_v23  ;;  %v660_v25 = vunpack.i.l.bf16 %v659_v23 }
  0xd7   : > { %468 = vmatpush.msra.mxu2 %v377_v2 }
  0xd8   : > { %v256_v29 = vsel %vm254_vm6, %v660_v25, %v625_v38  ;;  %v255_v33 = vsel %vm254_vm6, %v661_v24, %v660_v25  ;;  %v180_v38 = vsel %vm179_vm0, %v666_v22, %v665_v10 }
  0xd9   : > { %v347_v34 = vpop.permute.xlu1 %346  ;;  %469 = vmatpush.msra.mxu2 %v365_v28  ;;  %v372_v35 = vsel %vm370_vm8, %v368_v30, %v256_v29  ;;  %v371_v39 = vsel %vm370_vm8, %v367_v27, %v255_v33  ;;  %v359_v41 = vsel %vm358_vm5, %v721_v3, %v180_v38  ;;  %v146_v3 = vld [vmem:[%s886_s1 + $0x10] sm:$0xff] }
  0xda   : > { %570 = vmatmul.msk.f32.vlgmr.msra.gmra.mxu2 %vm386_vm15, %v144_v21  ;;  %v355_v20 = vsel %vm354_vm3, %v347_v34, %v770_v31  ;;  %v376_v32 = vsel %vm374_vm13, %v372_v35, %v282_v55  ;;  %v364_v31 = vsel %vm362_vm14, %v360_v37, %v207_v0  ;;  %v375_v4 = vsel %vm374_vm13, %v371_v39, %v281_v15 }
  0xdb   : > { %561 = vmatpush.msk.msra.mxu0 %vm358_vm5, %v355_v20  ;;  %576 = vmatpush.msk.msra.mxu3 %vm358_vm5, %v355_v20  ;;  %v363_v43 = vsel %vm362_vm14, %v359_v41, %v206_v13 }
  0xdc   : > { %442 = vmatpush.msra.mxu1 %v376_v32 }
  0xdd   : > { %415 = vmatpush.msra.mxu0 %v383_v40  ;;  %577 = vmatpush.msra.mxu3 %v383_v40 }
  0xde   : > { %443 = vmatpush.msra.mxu1 %v364_v31 }
  0xdf   : > { %416 = vmatpush.msra.mxu0 %v375_v4  ;;  %578 = vmatpush.msra.mxu3 %v375_v4 }
  0xe0   : > { %566 = vmatmul.msk.f32.vlgmr.msra.gmra.mxu1 %vm386_vm15, %v144_v21 }
  0xe1   : > { %417 = vmatpush.msra.mxu0 %v363_v43  ;;  %579 = vmatpush.msra.mxu3 %v363_v43 }
  0xe2   : > { %563 = vmatmul.msk.f32.vlgmr.msra.gmra.mxu3 %vm386_vm15, %v145_v42  ;;  %571 = vmatmul.msk.f32.gmra.mxu2 %vm386_vm15, %v145_v42 }
  0xe3   : > { %562 = vmatmul.msk.f32.vlgmr.msra.gmra.mxu0 %vm386_vm15, %v144_v21 }
  0xe8   : > { %567 = vmatmul.msk.f32.gmra.mxu1 %vm386_vm15, %v145_v42 }
  0xea   : > { %564 = vmatmul.msk.f32.gmra.mxu3 %vm386_vm15, %v146_v3  ;;  %572 = vmatmul.msk.f32.gmra.mxu2 %vm386_vm15, %v146_v3 }
  0xf0   : > { %568 = vmatmul.msk.f32.gmra.mxu1 %vm386_vm15, %v146_v3 }
 0x15d   : > { %v445_v44 = vpop.f32.mrf.mxu1  ;;  %v471_v45 = vpop.f32.mrf.mxu2 }
 0x15e   : > { %v481_v46 = vmax.f32 %v445_v44, 0.0  ;;  %v482_v47 = vmax.f32 %v471_v45, 0.0 }
 0x160   : > { %490 = vst [vmem:[%s143_s4 + $0x8] sm:$0xff] %v481_v46  ;;  %v419_v48 = vpop.f32.mrf.mxu0 }
 0x161   : > { %491 = vst [vmem:[%s143_s4 + $0x10] sm:$0xff] %v482_v47  ;;  %v480_v49 = vmax.f32 %v419_v48, 0.0 }
 0x163   : > { %489 = vst [vmem:[%s143_s4] sm:$0xff] %v480_v49 }
 0x165   : > { %v422_v50 = vpop.f32.mrf.mxu3  ;;  %v448_v51 = vpop.f32.mrf.mxu1 }
 0x166   : > { %v483_v52 = vmax.f32 %v422_v50, 0.0  ;;  %v484_v53 = vmax.f32 %v448_v51, 0.0  ;;  %v474_v54 = vpop.f32.mrf.mxu2 }
 0x167   : > { %v485_v55 = vmax.f32 %v474_v54, 0.0 }
 0x168   : > { %492 = vst [vmem:[%s143_s4 + $0x18] sm:$0xff] %v483_v52 }
 0x169   : > { %493 = vst [vmem:[%s143_s4 + $0x20] sm:$0xff] %v484_v53 }
 0x16a   : > { %494 = vst [vmem:[%s143_s4 + $0x28] sm:$0xff] %v485_v55 }
 0x16d   : > { %v425_v56 = vpop.f32.mrf.mxu3  ;;  %v451_v57 = vpop.f32.mrf.mxu1 }
 0x16e   : > { %v486_v58 = vmax.f32 %v425_v56, 0.0  ;;  %v487_v59 = vmax.f32 %v451_v57, 0.0  ;;  %v477_v60 = vpop.f32.mrf.mxu2 }
 0x16f   : > { %v488_v61 = vmax.f32 %v477_v60, 0.0 }
 0x170   : > { %495 = vst [vmem:[%s143_s4 + $0x30] sm:$0xff] %v486_v58 }
 0x171   : > { %496 = vst [vmem:[%s143_s4 + $0x38] sm:$0xff] %v487_v59 }
 0x172   : > { %497 = vst [vmem:[%s143_s4 + $0x40] sm:$0xff] %v488_v61 }
 0x173 PF: > { %s12_s9 = sadd.s32 1, %s673_s9  }
 0x174   : > { %p9_p4 = scmp.ge.s32.totalorder %s12_s9, 4  }
 0x176   :  { %11 = sbr.rel (!%p9_p4) target bundleno = 1 (0x1), region = 68 }

// kernel: wsod_forward.3
= control target key start
LH: loop header
LB: loop body
LE: loop exit
PB: predicated region body
PF: predicated region fallthrough
CT: control target
= control target key end

     0   :  { %10 = vsyncpa [#allocation5], 0  ;;  %s1962_s0 = inlined_call_operand.vmem [shape: f32[2,9216], index: 0, kind: input, shape index: {}]   ;;  %s1963_s1 = inlined_call_operand.vmem [shape: bf16[10,9216], index: 1, kind: input, shape index: {}]   ;;  %s1964_s2 = inlined_call_operand.vmem [shape: f32[1,10], index: 2, kind: input, shape index: {}]   ;;  %s1965_s3 = inlined_call_operand.hbm [shape: f32[2,10], index: 3, kind: output, shape index: {0}]   ;;  %s1966_s4 = inlined_call_operand.hbm [shape: f32[2,10], index: 4, kind: output, shape index: {1}]  }
   0x1   :  { %11 = vsyncpa [#allocation7], 0  ;;  %s1701_s15 = smov 0   ;;  %s1703_s16 = smov 0  }
   0x2   :  { %s1705_s17 = smov 0   ;;  %s1707_s18 = smov 0  }
   0x3   :  { %s1709_s19 = smov 0  }
   0x4 LB: > { %s1312_s20 = sadd.s32 4294967295, %s1671_s19   ;;  %s26_s21 = sadd.s32 1, %s1667_s18  ;;  %s1671_s19 = sphi %s1709_s19, %s17_s19   ;;  %s1667_s18 = sphi %s1707_s18, %s1971_s18   ;;  %s1663_s17 = sphi %s1705_s17, %s1970_s17   ;;  %s1659_s16 = sphi %s1703_s16, %s1969_s16   ;;  %s1655_s15 = sphi %s1701_s15, %s1968_s15  }
   0x5   : > { %p27_p0 = scmp.ge.s32.totalorder %s26_s21, 2  ;;  %p71_p1 = scmp.ne.s32.totalorder %s1659_s16, %s1655_s15 }
   0x6   : > { %p72_p2 = scmp.eq.s32.totalorder %s1671_s19, 0  ;;  %s64_s23 = sadd.s32 1, %s1659_s16 }
   0x7   : > { %s1973_s21 = smov (%p27_p0, %s26_s21), 0  ;;  %p1314_p5 = scmp.ge.s32.totalorder %s1671_s19, 2 }
   0x8   : > { %p73_p3 = por %p72_p2, %p71_p1  ;;  %s61_s22 = ssub.s32 %s1667_s18, %s1973_s21 }
   0x9   : > { %p62_p4 = scmp.eq.s32.totalorder %s61_s22, 0  ;;  %173 = sbr.rel (%p1314_p5) target bundleno = 55 (0x37), region = 20 }
   0xb   : > { %s1737_s24 = scalar_select %p62_p4, %s1659_s16, %s64_s23  }
   0xe   : > { %189 = sbr.rel (!%p73_p3) target bundleno = 55 (0x37), region = 28  ;;  %s191_s25 = sand.u32 (%p73_p3), 1, %s1659_s16  }
   0xf   : > { %s1470_s26 = smul.u32 (%p73_p3), 144, %s1667_s18 }
  0x10   : > { %s1507_s27 = smul.u32 (%p73_p3), 288, %s191_s25 }
  0x11   : > { %s1745_s30 = scalar_lea.vmem (%p73_p3), %s1963_s1, %s1470_s26 }
  0x12   : > { %v209_v0 = vld [vmem:[%s1745_s30] sm:$0xff] (%p73_p3)  ;;  %v211_v1 = vld [vmem:[%s1745_s30 + $0x8] sm:$0xff] (%p73_p3)  ;;  %v213_v2 = vld [vmem:[%s1745_s30 + $0x10] sm:$0xff] (%p73_p3)  ;;  %s1750_s5 = scalar_lea.vmem (%p73_p3), [#allocation3], %s1507_s27 }
  0x13   : > { %210 = vst [vmem:[%s1750_s5] sm:$0xff] %v209_v0  ;;  %v215_v3 = vld [vmem:[%s1745_s30 + $0x18] sm:$0xff]  ;;  %v217_v4 = vld [vmem:[%s1745_s30 + $0x20] sm:$0xff]  ;;  %v219_v5 = vld [vmem:[%s1745_s30 + $0x28] sm:$0xff] }
  0x14   : > { %212 = vst [vmem:[%s1750_s5 + $0x8] sm:$0xff] %v211_v1  ;;  %v221_v6 = vld [vmem:[%s1745_s30 + $0x30] sm:$0xff]  ;;  %v223_v7 = vld [vmem:[%s1745_s30 + $0x38] sm:$0xff]  ;;  %v225_v8 = vld [vmem:[%s1745_s30 + $0x40] sm:$0xff] }
  0x15   : > { %214 = vst [vmem:[%s1750_s5 + $0x10] sm:$0xff] %v213_v2  ;;  %v227_v9 = vld [vmem:[%s1745_s30 + $0x48] sm:$0xff]  ;;  %v229_v10 = vld [vmem:[%s1745_s30 + $0x50] sm:$0xff]  ;;  %v231_v11 = vld [vmem:[%s1745_s30 + $0x58] sm:$0xff] }
  0x16   : > { %216 = vst [vmem:[%s1750_s5 + $0x18] sm:$0xff] %v215_v3  ;;  %v233_v12 = vld [vmem:[%s1745_s30 + $0x60] sm:$0xff]  ;;  %v235_v13 = vld [vmem:[%s1745_s30 + $0x68] sm:$0xff]  ;;  %v237_v14 = vld [vmem:[%s1745_s30 + $0x70] sm:$0xff] }
  0x17   : > { %218 = vst [vmem:[%s1750_s5 + $0x20] sm:$0xff] %v217_v4  ;;  %v239_v15 = vld [vmem:[%s1745_s30 + $0x78] sm:$0xff]  ;;  %v241_v16 = vld [vmem:[%s1745_s30 + $0x80] sm:$0xff]  ;;  %v243_v17 = vld [vmem:[%s1745_s30 + $0x88] sm:$0xff] }
  0x18   : > { %220 = vst [vmem:[%s1750_s5 + $0x28] sm:$0xff] %v219_v5  ;;  %v245_v18 = vld [vmem:[%s1745_s30 + $0x120] sm:$0xff]  ;;  %v247_v19 = vld [vmem:[%s1745_s30 + $0x128] sm:$0xff]  ;;  %v249_v20 = vld [vmem:[%s1745_s30 + $0x130] sm:$0xff] }
  0x19   : > { %222 = vst [vmem:[%s1750_s5 + $0x30] sm:$0xff] %v221_v6  ;;  %v251_v21 = vld [vmem:[%s1745_s30 + $0x138] sm:$0xff]  ;;  %v253_v22 = vld [vmem:[%s1745_s30 + $0x140] sm:$0xff]  ;;  %v255_v23 = vld [vmem:[%s1745_s30 + $0x148] sm:$0xff] }
  0x1a   : > { %224 = vst [vmem:[%s1750_s5 + $0x38] sm:$0xff] %v223_v7  ;;  %v257_v24 = vld [vmem:[%s1745_s30 + $0x150] sm:$0xff]  ;;  %v259_v25 = vld [vmem:[%s1745_s30 + $0x158] sm:$0xff]  ;;  %v261_v26 = vld [vmem:[%s1745_s30 + $0x160] sm:$0xff] }
  0x1b   : > { %226 = vst [vmem:[%s1750_s5 + $0x40] sm:$0xff] %v225_v8  ;;  %v263_v27 = vld [vmem:[%s1745_s30 + $0x168] sm:$0xff]  ;;  %v265_v28 = vld [vmem:[%s1745_s30 + $0x170] sm:$0xff]  ;;  %v267_v29 = vld [vmem:[%s1745_s30 + $0x178] sm:$0xff] }
  0x1c   : > { %228 = vst [vmem:[%s1750_s5 + $0x48] sm:$0xff] %v227_v9  ;;  %v269_v30 = vld [vmem:[%s1745_s30 + $0x180] sm:$0xff]  ;;  %v271_v31 = vld [vmem:[%s1745_s30 + $0x188] sm:$0xff]  ;;  %v273_v32 = vld [vmem:[%s1745_s30 + $0x190] sm:$0xff] }
  0x1d   : > { %230 = vst [vmem:[%s1750_s5 + $0x50] sm:$0xff] %v229_v10  ;;  %v275_v33 = vld [vmem:[%s1745_s30 + $0x198] sm:$0xff]  ;;  %v277_v34 = vld [vmem:[%s1745_s30 + $0x1a0] sm:$0xff]  ;;  %v279_v35 = vld [vmem:[%s1745_s30 + $0x1a8] sm:$0xff] }
  0x1e   : > { %232 = vst [vmem:[%s1750_s5 + $0x58] sm:$0xff] %v231_v11 }
  0x1f   : > { %234 = vst [vmem:[%s1750_s5 + $0x60] sm:$0xff] %v233_v12 }
  0x20   : > { %236 = vst [vmem:[%s1750_s5 + $0x68] sm:$0xff] %v235_v13 }
  0x21   : > { %238 = vst [vmem:[%s1750_s5 + $0x70] sm:$0xff] %v237_v14 }
  0x22   : > { %240 = vst [vmem:[%s1750_s5 + $0x78] sm:$0xff] %v239_v15 }
  0x23   : > { %242 = vst [vmem:[%s1750_s5 + $0x80] sm:$0xff] %v241_v16 }
  0x24   : > { %244 = vst [vmem:[%s1750_s5 + $0x88] sm:$0xff] %v243_v17 }
  0x25   : > { %246 = vst [vmem:[%s1750_s5 + $0x90] sm:$0xff] %v245_v18 }
  0x26   : > { %248 = vst [vmem:[%s1750_s5 + $0x98] sm:$0xff] %v247_v19 }
  0x27   : > { %250 = vst [vmem:[%s1750_s5 + $0xa0] sm:$0xff] %v249_v20 }
  0x28   : > { %252 = vst [vmem:[%s1750_s5 + $0xa8] sm:$0xff] %v251_v21 }
  0x29   : > { %254 = vst [vmem:[%s1750_s5 + $0xb0] sm:$0xff] %v253_v22 }
  0x2a   : > { %256 = vst [vmem:[%s1750_s5 + $0xb8] sm:$0xff] %v255_v23 }
  0x2b   : > { %258 = vst [vmem:[%s1750_s5 + $0xc0] sm:$0xff] %v257_v24 }
  0x2c   : > { %260 = vst [vmem:[%s1750_s5 + $0xc8] sm:$0xff] %v259_v25 }
  0x2d   : > { %262 = vst [vmem:[%s1750_s5 + $0xd0] sm:$0xff] %v261_v26 }
  0x2e   : > { %264 = vst [vmem:[%s1750_s5 + $0xd8] sm:$0xff] %v263_v27 }
  0x2f   : > { %266 = vst [vmem:[%s1750_s5 + $0xe0] sm:$0xff] %v265_v28 }
  0x30   : > { %268 = vst [vmem:[%s1750_s5 + $0xe8] sm:$0xff] %v267_v29 }
  0x31   : > { %270 = vst [vmem:[%s1750_s5 + $0xf0] sm:$0xff] %v269_v30 }
  0x32   : > { %272 = vst [vmem:[%s1750_s5 + $0xf8] sm:$0xff] %v271_v31 }
  0x33   : > { %274 = vst [vmem:[%s1750_s5 + $0x100] sm:$0xff] %v273_v32 }
  0x34   : > { %276 = vst [vmem:[%s1750_s5 + $0x108] sm:$0xff] %v275_v33 }
  0x35   : > { %278 = vst [vmem:[%s1750_s5 + $0x110] sm:$0xff] %v277_v34 }
  0x36   : > { %280 = vst [vmem:[%s1750_s5 + $0x118] sm:$0xff] %v279_v35 }
  0x37 PF: > { %p1316_p6 = scmp.ge.s32.totalorder %s1671_s19, 1  ;;  %p285_p7 = scmp.lt.s32.totalorder %s1671_s19, 3 }
  0x39   : > { %p286_p8 = pnand %p1316_p6, %p285_p7 }
  0x3a   : > { %s292_s6 = sand.u32 (!%p286_p8), 1, %s1655_s15   ;;  %s321_s7 = smul.u32 (!%p286_p8), 36, %s1663_s17 }
  0x3b   : > { %289 = sbr.rel (%p286_p8) target bundleno = 637 (0x27d), region = 51  ;;  %p1318_p10 = scmp.ne.s32.totalorder (!%p286_p8), %s1663_s17, 0 }
  0x3c   : > { %s1508_s8 = smul.u32 (!%p286_p8), 288, %s292_s6  ;;  %p324_p9 = scmp.lt.s32.totalorder (!%p286_p8), %s321_s7, 71 }
  0x3e   : > { %s1830_s13 = scalar_lea.vmem (!%p286_p8), [#allocation3], %s1508_s8 }
  0x40   : > { %s1975_s7 = smov (!%p324_p9, %s321_s7), 71  ;;  %336 = sbr.rel (%p1318_p10) target bundleno = 71 (0x47), region = 59 }
  0x41   : > { %s1317_s9 = sshll.u32 %s1975_s7, 1 }
  0x42   : > { %s1828_s12 = scalar_lea.vmem %s1962_s0, %s1317_s9 }
  0x45   : > { %vm337_vm0 = vcmask 74752   ;;  %v1673_v36 = vmov 0.0  }
  0x46   : > { %338 = vst.msk [vmem:[#allocation2] sm:$0x3] %vm337_vm0, %v1673_v36 }
  0x47 PF: > { %v1321_v37 = vld [vmem:[%s1830_s13] sm:$0xf]  ;;  %v1489_v38 = vld [vmem:[%s1830_s13 + $0x8c] sm:$0x10]  ;;  %v1471_v39 = vld [vmem:[%s1830_s13 + $0x4] sm:$0xf] }
  0x48   : > { %v1322_v40 = vor.u32 %v1489_v38, %v1321_v37  ;;  %v1323_v41 = vld [vmem:[%s1830_s13 + $0x90] sm:$0x10]  ;;  %v1329_v42 = vld [vmem:[%s1830_s13 + $0x8] sm:$0xf]  ;;  %v1490_v43 = vld [vmem:[%s1830_s13 + $0x94] sm:$0x10] }
  0x49   : > { %v1326_v44 = vor.u32 %v1471_v39, %v1323_v41  ;;  %v1330_v45 = vor.u32 %v1490_v43, %v1329_v42  ;;  %v1472_v46 = vld [vmem:[%s1830_s13 + $0xc] sm:$0xf]  ;;  %v1331_v47 = vld [vmem:[%s1830_s13 + $0x98] sm:$0x10]  ;;  %v1345_v50 = vld [vmem:[%s1830_s13 + $0x18] sm:$0xf] }
  0x4a   : > { %v339_v48 = vld [vmem:[%s1828_s12] sm:$0xff]  ;;  %699 = vmatpush.bf16.xpose.msra.mxu0 %v1322_v40  ;;  %v1334_v49 = vor.u32 %v1472_v46, %v1331_v47  ;;  %v340_v51 = vld [vmem:[%s1828_s12 + $0x8] sm:$0xff]  ;;  %v1492_v52 = vld [vmem:[%s1830_s13 + $0xa4] sm:$0x10]  ;;  %vm1161_vm1 = vcmask 74752   ;;  %p1463_p11 = scmp.ne.s32.totalorder %s1663_s17, 1 }
  0x4b   : > { %357 = vst [vmem:[#allocation1] ss:$4 sm:$0xff] %v339_v48  ;;  %712 = vmatpush.bf16.xpose.msra.mxu1 %v1326_v44  ;;  %725 = vmatpush.bf16.xpose.msra.mxu2 %v1330_v45  ;;  %v1474_v53 = vld [vmem:[%s1830_s13 + $0x1c] sm:$0xf]  ;;  %v1347_v54 = vld [vmem:[%s1830_s13 + $0xa8] sm:$0x10]  ;;  %v1346_v55 = vor.u32 %v1492_v52, %v1345_v50 }
  0x4c   : > { %738 = vmatpush.bf16.xpose.msra.mxu3 %v1334_v49  ;;  %v1350_v56 = vor.u32 %v1474_v53, %v1347_v54  ;;  %v1337_v57 = vld [vmem:[%s1830_s13 + $0x10] sm:$0xf]  ;;  %v1491_v58 = vld [vmem:[%s1830_s13 + $0x9c] sm:$0x10]  ;;  %v1473_v59 = vld [vmem:[%s1830_s13 + $0x14] sm:$0xf] }
  0x4d   : > { %v1338_v60 = vor.u32 %v1491_v58, %v1337_v57  ;;  %v1339_v61 = vld [vmem:[%s1830_s13 + $0xa0] sm:$0x10]  ;;  %359 = vst [vmem:[#allocation1 + $0x20] ss:$4 sm:$0xff] %v340_v51  ;;  %v341_v62 = vld [vmem:[%s1828_s12 + $0x10] sm:$0xff]  ;;  %v342_v18 = vld [vmem:[%s1828_s12 + $0x18] sm:$0xff] }
  0x4e   : > { %v1342_v63 = vor.u32 %v1473_v59, %v1339_v61  ;;  %v1361_v0 = vld [vmem:[%s1830_s13 + $0x28] sm:$0xf]  ;;  %v1494_v1 = vld [vmem:[%s1830_s13 + $0xb4] sm:$0x10]  ;;  %v1476_v2 = vld [vmem:[%s1830_s13 + $0x2c] sm:$0xf] }
  0x4f   : > { %v1363_v3 = vld [vmem:[%s1830_s13 + $0xb8] sm:$0x10]  ;;  %v1353_v4 = vld [vmem:[%s1830_s13 + $0x20] sm:$0xf]  ;;  %v1493_v5 = vld [vmem:[%s1830_s13 + $0xac] sm:$0x10]  ;;  %v1362_v14 = vor.u32 %v1494_v1, %v1361_v0 }
  0x50   : > { %v1475_v6 = vld [vmem:[%s1830_s13 + $0x24] sm:$0xf]  ;;  %v1355_v7 = vld [vmem:[%s1830_s13 + $0xb0] sm:$0x10]  ;;  %v1366_v15 = vor.u32 %v1476_v2, %v1363_v3  ;;  %v1354_v19 = vor.u32 %v1493_v5, %v1353_v4  ;;  %v343_v25 = vld [vmem:[%s1828_s12 + $0x20] sm:$0xff] }
  0x51   : > { %v1358_v20 = vor.u32 %v1475_v6, %v1355_v7  ;;  %v1377_v30 = vld [vmem:[%s1830_s13 + $0x38] sm:$0xf]  ;;  %v1496_v31 = vld [vmem:[%s1830_s13 + $0xc4] sm:$0x10]  ;;  %v1478_v32 = vld [vmem:[%s1830_s13 + $0x3c] sm:$0xf] }
  0x52   : > { %751 = vmatpush.bf16.xpose.msrb.mxu0 %v1338_v60  ;;  %v360_v8 = vld.sshfl [vmem:[#allocation1] sm:$0xff pattern:$0x73625140]  ;;  %v361_v9 = vld.sshfl [vmem:[#allocation1 + $0x8] sm:$0xff pattern:$0x73625140]  ;;  %v1378_v42 = vor.u32 %v1496_v31, %v1377_v30 }
  0x53   : > { %777 = vmatpush.bf16.xpose.msrb.mxu2 %v1346_v55  ;;  %764 = vmatpush.bf16.xpose.msrb.mxu1 %v1342_v63  ;;  %v439_v10 = vpack.c.bf16 %v360_v8, %v360_v8  ;;  %v440_v11 = vpack.c.bf16 %v361_v9, %v361_v9  ;;  %v362_v12 = vld.sshfl [vmem:[#allocation1 + $0x10] sm:$0xff pattern:$0x73625140]  ;;  %v363_v13 = vld.sshfl [vmem:[#allocation1 + $0x18] sm:$0xff pattern:$0x73625140] }
  0x54   : > { %790 = vmatpush.bf16.xpose.msrb.mxu3 %v1350_v56  ;;  %v441_v16 = vpack.c.bf16 %v362_v12, %v362_v12  ;;  %368 = vst [vmem:[#allocation1] ss:$4 sm:$0xff] %v341_v62  ;;  %v442_v17 = vpack.c.bf16 %v363_v13, %v363_v13  ;;  %v364_v21 = vld.sshfl [vmem:[#allocation1 + $0x20] sm:$0xff pattern:$0x73625140]  ;;  %v344_v49 = vld [vmem:[%s1828_s12 + $0x28] sm:$0xff] }
  0x55   : > { %700 = vmatmul.bf16.vlgmr.msra.gmra.mxu0 %v439_v10  ;;  %713 = vmatmul.bf16.vlgmr.msra.gmra.mxu1 %v440_v11  ;;  %v365_v22 = vld.sshfl [vmem:[#allocation1 + $0x28] sm:$0xff pattern:$0x73625140]  ;;  %v366_v23 = vld.sshfl [vmem:[#allocation1 + $0x30] sm:$0xff pattern:$0x73625140]  ;;  %v443_v35 = vpack.c.bf16 %v364_v21, %v364_v21 }
  0x56   : > { %726 = vmatmul.bf16.vlgmr.msra.gmra.mxu2 %v441_v16  ;;  %739 = vmatmul.bf16.vlgmr.msra.gmra.mxu3 %v442_v17  ;;  %v367_v24 = vld.sshfl [vmem:[#allocation1 + $0x38] sm:$0xff pattern:$0x73625140]  ;;  %v1379_v33 = vld [vmem:[%s1830_s13 + $0xc8] sm:$0x10]  ;;  %v444_v36 = vpack.c.bf16 %v365_v22, %v365_v22  ;;  %v445_v40 = vpack.c.bf16 %v366_v23, %v366_v23 }
  0x57   : > { %369 = vst [vmem:[#allocation1 + $0x20] ss:$4 sm:$0xff] %v342_v18  ;;  %v1369_v34 = vld [vmem:[%s1830_s13 + $0x30] sm:$0xf]  ;;  %v1495_v37 = vld [vmem:[%s1830_s13 + $0xbc] sm:$0x10]  ;;  %v446_v41 = vpack.c.bf16 %v367_v24, %v367_v24  ;;  %v1382_v43 = vor.u32 %v1478_v32, %v1379_v33 }
  0x58   : > { %v1477_v38 = vld [vmem:[%s1830_s13 + $0x34] sm:$0xf]  ;;  %v1371_v39 = vld [vmem:[%s1830_s13 + $0xc0] sm:$0x10]  ;;  %v1370_v44 = vor.u32 %v1495_v37, %v1369_v34  ;;  %v1393_v51 = vld [vmem:[%s1830_s13 + $0x48] sm:$0xf] }
  0x59   : > { %v1374_v45 = vor.u32 %v1477_v38, %v1371_v39  ;;  %v1498_v52 = vld [vmem:[%s1830_s13 + $0xd4] sm:$0x10]  ;;  %v1480_v53 = vld [vmem:[%s1830_s13 + $0x4c] sm:$0xf]  ;;  %v1395_v54 = vld [vmem:[%s1830_s13 + $0xd8] sm:$0x10] }
  0x5a   : > { %803 = vmatpush.bf16.xpose.msra.mxu0 %v1354_v19  ;;  %v1385_v55 = vld [vmem:[%s1830_s13 + $0x40] sm:$0xf]  ;;  %v1497_v58 = vld [vmem:[%s1830_s13 + $0xcc] sm:$0x10]  ;;  %v1479_v59 = vld [vmem:[%s1830_s13 + $0x44] sm:$0xf]  ;;  %v1394_v63 = vor.u32 %v1498_v52, %v1393_v51  ;;  %v1398_v0 = vor.u32 %v1480_v53, %v1395_v54 }
  0x5b   : > { %829 = vmatpush.bf16.xpose.msra.mxu2 %v1362_v14  ;;  %816 = vmatpush.bf16.xpose.msra.mxu1 %v1358_v20  ;;  %v370_v26 = vld.sshfl [vmem:[#allocation1] sm:$0xff pattern:$0x73625140]  ;;  %v371_v27 = vld.sshfl [vmem:[#allocation1 + $0x8] sm:$0xff pattern:$0x73625140]  ;;  %v1386_v1 = vor.u32 %v1497_v58, %v1385_v55 }
  0x5c   : > { %842 = vmatpush.bf16.xpose.msra.mxu3 %v1366_v15  ;;  %v372_v28 = vld.sshfl [vmem:[#allocation1 + $0x10] sm:$0xff pattern:$0x73625140]  ;;  %v373_v29 = vld.sshfl [vmem:[#allocation1 + $0x18] sm:$0xff pattern:$0x73625140]  ;;  %v447_v56 = vpack.c.bf16 %v370_v26, %v370_v26  ;;  %v448_v57 = vpack.c.bf16 %v371_v27, %v371_v27 }
  0x5d   : > { %378 = vst [vmem:[#allocation1] ss:$4 sm:$0xff] %v343_v25  ;;  %v1387_v60 = vld [vmem:[%s1830_s13 + $0xd0] sm:$0x10]  ;;  %v449_v61 = vpack.c.bf16 %v372_v28, %v372_v28  ;;  %v450_v62 = vpack.c.bf16 %v373_v29, %v373_v29  ;;  %v1409_v3 = vld [vmem:[%s1830_s13 + $0x58] sm:$0xf] }
  0x5e   : > { %v374_v46 = vld.sshfl [vmem:[#allocation1 + $0x20] sm:$0xff pattern:$0x73625140]  ;;  %v375_v47 = vld.sshfl [vmem:[#allocation1 + $0x28] sm:$0xff pattern:$0x73625140]  ;;  %v1390_v2 = vor.u32 %v1479_v59, %v1387_v60 }
  0x5f   : > { %v376_v48 = vld.sshfl [vmem:[#allocation1 + $0x30] sm:$0xff pattern:$0x73625140]  ;;  %v377_v50 = vld.sshfl [vmem:[#allocation1 + $0x38] sm:$0xff pattern:$0x73625140]  ;;  %v451_v8 = vpack.c.bf16 %v374_v46, %v374_v46  ;;  %v452_v9 = vpack.c.bf16 %v375_v47, %v375_v47 }
  0x60   : > { %379 = vst [vmem:[#allocation1 + $0x20] ss:$4 sm:$0xff] %v344_v49  ;;  %v1500_v4 = vld [vmem:[%s1830_s13 + $0xe4] sm:$0x10]  ;;  %v1482_v5 = vld [vmem:[%s1830_s13 + $0x5c] sm:$0xf]  ;;  %v453_v13 = vpack.c.bf16 %v376_v48, %v376_v48  ;;  %v454_v14 = vpack.c.bf16 %v377_v50, %v377_v50 }
  0x61   : > { %v1411_v6 = vld [vmem:[%s1830_s13 + $0xe8] sm:$0x10]  ;;  %v1401_v7 = vld [vmem:[%s1830_s13 + $0x50] sm:$0xf]  ;;  %v1499_v10 = vld [vmem:[%s1830_s13 + $0xdc] sm:$0x10]  ;;  %v1410_v15 = vor.u32 %v1500_v4, %v1409_v3 }
  0x62   : > { %v1481_v11 = vld [vmem:[%s1830_s13 + $0x54] sm:$0xf]  ;;  %v1403_v12 = vld [vmem:[%s1830_s13 + $0xe0] sm:$0x10]  ;;  %v1414_v16 = vor.u32 %v1482_v5, %v1411_v6  ;;  %v1402_v17 = vor.u32 %v1499_v10, %v1401_v7  ;;  %v345_v23 = vld [vmem:[%s1828_s12 + $0x30] sm:$0xff] }
  0x63   : > { %v1406_v18 = vor.u32 %v1481_v11, %v1403_v12  ;;  %v1425_v24 = vld [vmem:[%s1830_s13 + $0x68] sm:$0xf]  ;;  %v1502_v25 = vld [vmem:[%s1830_s13 + $0xf4] sm:$0x10]  ;;  %v1484_v26 = vld [vmem:[%s1830_s13 + $0x6c] sm:$0xf] }
  0x64   : > { %v380_v19 = vld.sshfl [vmem:[#allocation1] sm:$0xff pattern:$0x73625140]  ;;  %v381_v20 = vld.sshfl [vmem:[#allocation1 + $0x8] sm:$0xff pattern:$0x73625140] }
  0x65   : > { %752 = vmatmul.bf16.vlgmr.msrb.gmra.mxu0 %v443_v35  ;;  %765 = vmatmul.bf16.vlgmr.msrb.gmra.mxu1 %v444_v36  ;;  %v382_v21 = vld.sshfl [vmem:[#allocation1 + $0x10] sm:$0xff pattern:$0x73625140]  ;;  %v383_v22 = vld.sshfl [vmem:[#allocation1 + $0x18] sm:$0xff pattern:$0x73625140]  ;;  %v455_v29 = vpack.c.bf16 %v380_v19, %v380_v19  ;;  %v456_v30 = vpack.c.bf16 %v381_v20, %v381_v20  ;;  %v1426_v36 = vor.u32 %v1502_v25, %v1425_v24 }
  0x66   : > { %778 = vmatmul.bf16.vlgmr.msrb.gmra.mxu2 %v445_v40  ;;  %791 = vmatmul.bf16.vlgmr.msrb.gmra.mxu3 %v446_v41  ;;  %388 = vst [vmem:[#allocation1] ss:$4 sm:$0xff] %v345_v23  ;;  %v1427_v27 = vld [vmem:[%s1830_s13 + $0xf8] sm:$0x10]  ;;  %v1417_v28 = vld [vmem:[%s1830_s13 + $0x60] sm:$0xf]  ;;  %v457_v34 = vpack.c.bf16 %v382_v21, %v382_v21  ;;  %v458_v35 = vpack.c.bf16 %v383_v22, %v383_v22 }
  0x67   : > { %881 = vmatpush.bf16.xpose.msrb.mxu2 %v1378_v42  ;;  %894 = vmatpush.bf16.xpose.msrb.mxu3 %v1382_v43  ;;  %v1501_v31 = vld [vmem:[%s1830_s13 + $0xec] sm:$0x10]  ;;  %v1483_v32 = vld [vmem:[%s1830_s13 + $0x64] sm:$0xf]  ;;  %v1419_v33 = vld [vmem:[%s1830_s13 + $0xf0] sm:$0x10]  ;;  %v1430_v37 = vor.u32 %v1484_v26, %v1427_v27 }
  0x68   : > { %855 = vmatpush.bf16.xpose.msrb.mxu0 %v1370_v44  ;;  %868 = vmatpush.bf16.xpose.msrb.mxu1 %v1374_v45  ;;  %v1418_v38 = vor.u32 %v1501_v31, %v1417_v28  ;;  %v1422_v39 = vor.u32 %v1483_v32, %v1419_v33  ;;  %v384_v40 = vld.sshfl [vmem:[#allocation1 + $0x20] sm:$0xff pattern:$0x73625140]  ;;  %v385_v41 = vld.sshfl [vmem:[#allocation1 + $0x28] sm:$0xff pattern:$0x73625140] }
  0x69   : > { %v386_v42 = vld.sshfl [vmem:[#allocation1 + $0x30] sm:$0xff pattern:$0x73625140]  ;;  %v387_v43 = vld.sshfl [vmem:[#allocation1 + $0x38] sm:$0xff pattern:$0x73625140]  ;;  %v459_v50 = vpack.c.bf16 %v384_v40, %v384_v40  ;;  %v460_v51 = vpack.c.bf16 %v385_v41, %v385_v41 }
  0x6a   : > { %v346_v44 = vld [vmem:[%s1828_s12 + $0x38] sm:$0xff]  ;;  %v1441_v45 = vld [vmem:[%s1830_s13 + $0x78] sm:$0xf]  ;;  %v1504_v46 = vld [vmem:[%s1830_s13 + $0x104] sm:$0x10]  ;;  %v461_v55 = vpack.c.bf16 %v386_v42, %v386_v42 }
  0x6b   : > { %389 = vst [vmem:[#allocation1 + $0x20] ss:$4 sm:$0xff] %v346_v44  ;;  %v1486_v47 = vld [vmem:[%s1830_s13 + $0x7c] sm:$0xf]  ;;  %v1443_v48 = vld [vmem:[%s1830_s13 + $0x108] sm:$0x10] }
  0x6c   : > { %v1433_v49 = vld [vmem:[%s1830_s13 + $0x70] sm:$0xf]  ;;  %v1503_v52 = vld [vmem:[%s1830_s13 + $0xfc] sm:$0x10]  ;;  %v1485_v53 = vld [vmem:[%s1830_s13 + $0x74] sm:$0xf]  ;;  %v1446_v58 = vor.u32 %v1486_v47, %v1443_v48 }
  0x6d   : > { %v1435_v54 = vld [vmem:[%s1830_s13 + $0x100] sm:$0x10]  ;;  %v1434_v59 = vor.u32 %v1503_v52, %v1433_v49  ;;  %v1506_v3 = vld [vmem:[%s1830_s13 + $0x114] sm:$0x10]  ;;  %v1488_v4 = vld [vmem:[%s1830_s13 + $0x8c] sm:$0xf] }
  0x6e   : > { %v1438_v60 = vor.u32 %v1485_v53, %v1435_v54  ;;  %v1459_v5 = vld [vmem:[%s1830_s13 + $0x118] sm:$0x10]  ;;  %v1449_v6 = vld [vmem:[%s1830_s13 + $0x80] sm:$0xf]  ;;  %v1487_v10 = vld [vmem:[%s1830_s13 + $0x84] sm:$0xf] }
  0x6f   : > { %v1451_v11 = vld [vmem:[%s1830_s13 + $0x110] sm:$0x10] }
  0x72   : > { %v395_v19 = vld.sshfl [vmem:[#allocation1 + $0x28] sm:$0xff pattern:$0x73625140]  ;;  %v396_v20 = vld.sshfl [vmem:[#allocation1 + $0x30] sm:$0xff pattern:$0x73625140] }
  0x73   : > { %v397_v21 = vld.sshfl [vmem:[#allocation1 + $0x38] sm:$0xff pattern:$0x73625140]  ;;  %v468_v23 = vpack.c.bf16 %v395_v19, %v395_v19  ;;  %v469_v24 = vpack.c.bf16 %v396_v20, %v396_v20 }
  0x74   : > { %v470_v25 = vpack.c.bf16 %v397_v21, %v397_v21 }
  0x75   : > { %804 = vmatmul.bf16.vlgmr.msra.gmra.mxu0 %v447_v56  ;;  %817 = vmatmul.bf16.vlgmr.msra.gmra.mxu1 %v448_v57  ;;  %v462_v56 = vpack.c.bf16 %v387_v43, %v387_v43  ;;  %v1442_v57 = vor.u32 %v1504_v46, %v1441_v45 }
  0x76   : > { %830 = vmatmul.bf16.vlgmr.msra.gmra.mxu2 %v449_v61  ;;  %843 = vmatmul.bf16.vlgmr.msra.gmra.mxu3 %v450_v62  ;;  %v390_v61 = vld.sshfl [vmem:[#allocation1] sm:$0xff pattern:$0x73625140]  ;;  %v391_v62 = vld.sshfl [vmem:[#allocation1 + $0x8] sm:$0xff pattern:$0x73625140] }
  0x77   : > { %933 = vmatpush.bf16.xpose.msra.mxu2 %v1394_v63  ;;  %946 = vmatpush.bf16.xpose.msra.mxu3 %v1398_v0  ;;  %v392_v63 = vld.sshfl [vmem:[#allocation1 + $0x10] sm:$0xff pattern:$0x73625140]  ;;  %v393_v0 = vld.sshfl [vmem:[#allocation1 + $0x18] sm:$0xff pattern:$0x73625140]  ;;  %v463_v7 = vpack.c.bf16 %v390_v61, %v390_v61 }
  0x78   : > { %907 = vmatpush.bf16.xpose.msra.mxu0 %v1386_v1  ;;  %920 = vmatpush.bf16.xpose.msra.mxu1 %v1390_v2  ;;  %v347_v1 = vld [vmem:[%s1828_s12 + $0x40] sm:$0xff]  ;;  %v1457_v2 = vld [vmem:[%s1830_s13 + $0x88] sm:$0xf]  ;;  %v465_v12 = vpack.c.bf16 %v392_v63, %v392_v63 }
  0x79   : > { %398 = vst [vmem:[#allocation1] ss:$4 sm:$0xff] %v347_v1 }
  0x80   : > { %v399_v26 = vld.sshfl [vmem:[#allocation1] sm:$0xff pattern:$0x73625140]  ;;  %v400_v27 = vld.sshfl [vmem:[#allocation1 + $0x8] sm:$0xff pattern:$0x73625140] }
  0x81   : > { %v401_v28 = vld.sshfl [vmem:[#allocation1 + $0x10] sm:$0xff pattern:$0x73625140]  ;;  %v472_v31 = vpack.c.bf16 %v400_v27, %v400_v27 }
  0x85   : > { %856 = vmatmul.bf16.vlgmr.msrb.gmra.mxu0 %v451_v8  ;;  %869 = vmatmul.bf16.vlgmr.msrb.gmra.mxu1 %v452_v9  ;;  %v464_v8 = vpack.c.bf16 %v391_v62, %v391_v62  ;;  %v1505_v9 = vld [vmem:[%s1830_s13 + $0x10c] sm:$0x10] }
  0x86   : > { %882 = vmatmul.bf16.vlgmr.msrb.gmra.mxu2 %v453_v13  ;;  %895 = vmatmul.bf16.vlgmr.msrb.gmra.mxu3 %v454_v14  ;;  %v466_v13 = vpack.c.bf16 %v393_v0, %v393_v0  ;;  %v1458_v14 = vor.u32 %v1506_v3, %v1457_v2 }
  0x87   : > { %985 = vmatpush.bf16.xpose.msrb.mxu2 %v1410_v15  ;;  %998 = vmatpush.bf16.xpose.msrb.mxu3 %v1414_v16  ;;  %v1462_v15 = vor.u32 %v1488_v4, %v1459_v5  ;;  %v1450_v16 = vor.u32 %v1505_v9, %v1449_v6 }
  0x88   : > { %959 = vmatpush.bf16.xpose.msrb.mxu0 %v1402_v17  ;;  %972 = vmatpush.bf16.xpose.msrb.mxu1 %v1406_v18  ;;  %v1454_v17 = vor.u32 %v1487_v10, %v1451_v11  ;;  %v394_v18 = vld.sshfl [vmem:[#allocation1 + $0x20] sm:$0xff pattern:$0x73625140] }
  0x89   : > { %v467_v22 = vpack.c.bf16 %v394_v18, %v394_v18 }
  0x95   : > { %908 = vmatmul.bf16.vlgmr.msra.gmra.mxu0 %v455_v29  ;;  %921 = vmatmul.bf16.vlgmr.msra.gmra.mxu1 %v456_v30  ;;  %v402_v29 = vld.sshfl [vmem:[#allocation1 + $0x18] sm:$0xff pattern:$0x73625140]  ;;  %v471_v30 = vpack.c.bf16 %v399_v26, %v399_v26 }
  0x96   : > { %934 = vmatmul.bf16.vlgmr.msra.gmra.mxu2 %v457_v34  ;;  %947 = vmatmul.bf16.vlgmr.msra.gmra.mxu3 %v458_v35  ;;  %v473_v34 = vpack.c.bf16 %v401_v28, %v401_v28  ;;  %v474_v35 = vpack.c.bf16 %v402_v29, %v402_v29 }
  0x97   : > { %1037 = vmatpush.bf16.xpose.msra.mxu2 %v1426_v36  ;;  %1050 = vmatpush.bf16.xpose.msra.mxu3 %v1430_v37 }
  0x98   : > { %1011 = vmatpush.bf16.xpose.msra.mxu0 %v1418_v38  ;;  %1024 = vmatpush.bf16.xpose.msra.mxu1 %v1422_v39 }
  0xa5   : > { %960 = vmatmul.bf16.vlgmr.msrb.gmra.mxu0 %v459_v50  ;;  %973 = vmatmul.bf16.vlgmr.msrb.gmra.mxu1 %v460_v51 }
  0xa6   : > { %986 = vmatmul.bf16.vlgmr.msrb.gmra.mxu2 %v461_v55  ;;  %999 = vmatmul.bf16.vlgmr.msrb.gmra.mxu3 %v462_v56 }
  0xa7   : > { %1089 = vmatpush.bf16.xpose.msrb.mxu2 %v1442_v57  ;;  %1102 = vmatpush.bf16.xpose.msrb.mxu3 %v1446_v58 }
  0xa8   : > { %1063 = vmatpush.bf16.xpose.msrb.mxu0 %v1434_v59  ;;  %1076 = vmatpush.bf16.xpose.msrb.mxu1 %v1438_v60 }
  0xb5   : > { %1012 = vmatmul.bf16.vlgmr.msra.gmra.mxu0 %v463_v7  ;;  %1025 = vmatmul.bf16.vlgmr.msra.gmra.mxu1 %v464_v8 }
  0xb6   : > { %1038 = vmatmul.bf16.vlgmr.msra.gmra.mxu2 %v465_v12  ;;  %1051 = vmatmul.bf16.vlgmr.msra.gmra.mxu3 %v466_v13 }
  0xb7   : > { %1141 = vmatpush.bf16.xpose.msra.mxu2 %v1458_v14  ;;  %1154 = vmatpush.bf16.xpose.msra.mxu3 %v1462_v15 }
  0xb8   : > { %1115 = vmatpush.bf16.xpose.msra.mxu0 %v1450_v16  ;;  %1128 = vmatpush.bf16.xpose.msra.mxu1 %v1454_v17 }
  0xc5   : > { %1064 = vmatmul.bf16.vlgmr.msrb.gmra.mxu0 %v467_v22  ;;  %1077 = vmatmul.bf16.vlgmr.msrb.gmra.mxu1 %v468_v23 }
  0xc6   : > { %1090 = vmatmul.bf16.vlgmr.msrb.gmra.mxu2 %v469_v24  ;;  %1103 = vmatmul.bf16.vlgmr.msrb.gmra.mxu3 %v470_v25 }
  0xd2   : > { %v701_v32 = vpop.f32.mrf.mxu0  ;;  %v714_v33 = vpop.f32.mrf.mxu1 }
  0xd3   : > { %v715_v36 = vadd.f32 %v714_v33, %v701_v32 }
  0xd5   : > { %1116 = vmatmul.bf16.vlgmr.msra.gmra.mxu0 %v471_v30  ;;  %1129 = vmatmul.bf16.vlgmr.msra.gmra.mxu1 %v472_v31 }
  0xd6   : > { %1142 = vmatmul.bf16.vlgmr.msra.gmra.mxu2 %v473_v34  ;;  %1155 = vmatmul.bf16.vlgmr.msra.gmra.mxu3 %v474_v35 }
  0xd9   : > { %v727_v37 = vpop.f32.mrf.mxu2  ;;  %v740_v38 = vpop.f32.mrf.mxu3 }
  0xda   : > { %v728_v39 = vadd.f32 %v727_v37, %v715_v36  ;;  %v703_v40 = vpop.f32.mrf.mxu0  ;;  %v716_v41 = vpop.f32.mrf.mxu1 }
  0xdc   : > { %v741_v42 = vadd.f32 %v740_v38, %v728_v39 }
  0xe1   : > { %v729_v43 = vpop.f32.mrf.mxu2  ;;  %v742_v44 = vpop.f32.mrf.mxu3 }
  0xe2   : > { %v753_v45 = vpop.f32.mrf.mxu0  ;;  %v766_v46 = vpop.f32.mrf.mxu1 }
  0xe3   : > { %v754_v59 = vadd.f32 %v753_v45, %v741_v42 }
  0xe5   : > { %v767_v0 = vadd.f32 %v766_v46, %v754_v59 }
  0xe9   : > { %v779_v47 = vpop.f32.mrf.mxu2  ;;  %v792_v48 = vpop.f32.mrf.mxu3 }
  0xea   : > { %v755_v49 = vpop.f32.mrf.mxu0  ;;  %v768_v50 = vpop.f32.mrf.mxu1  ;;  %v780_v1 = vadd.f32 %v779_v47, %v767_v0 }
  0xec   : > { %v793_v4 = vadd.f32 %v792_v48, %v780_v1 }
  0xf1   : > { %v781_v51 = vpop.f32.mrf.mxu2  ;;  %v794_v52 = vpop.f32.mrf.mxu3 }
  0xf2   : > { %v805_v53 = vpop.f32.mrf.mxu0  ;;  %v818_v54 = vpop.f32.mrf.mxu1 }
  0xf3   : > { %v806_v7 = vadd.f32 %v805_v53, %v793_v4 }
  0xf5   : > { %v819_v8 = vadd.f32 %v818_v54, %v806_v7 }
  0xf9   : > { %v831_v55 = vpop.f32.mrf.mxu2  ;;  %v844_v56 = vpop.f32.mrf.mxu3 }
  0xfa   : > { %v807_v57 = vpop.f32.mrf.mxu0  ;;  %v820_v58 = vpop.f32.mrf.mxu1  ;;  %v832_v11 = vadd.f32 %v831_v55, %v819_v8 }
  0xfc   : > { %v845_v14 = vadd.f32 %v844_v56, %v832_v11 }
 0x101   : > { %v833_v60 = vpop.f32.mrf.mxu2  ;;  %v846_v61 = vpop.f32.mrf.mxu3 }
 0x102   : > { %v857_v62 = vpop.f32.mrf.mxu0  ;;  %v870_v63 = vpop.f32.mrf.mxu1 }
 0x103   : > { %v858_v15 = vadd.f32 %v857_v62, %v845_v14 }
 0x105   : > { %v871_v20 = vadd.f32 %v870_v63, %v858_v15 }
 0x109   : > { %v883_v2 = vpop.f32.mrf.mxu2  ;;  %v896_v3 = vpop.f32.mrf.mxu3 }
 0x10a   : > { %v859_v5 = vpop.f32.mrf.mxu0  ;;  %v872_v6 = vpop.f32.mrf.mxu1  ;;  %v884_v21 = vadd.f32 %v883_v2, %v871_v20 }
 0x10c   : > { %v897_v24 = vadd.f32 %v896_v3, %v884_v21 }
 0x111   : > { %v885_v9 = vpop.f32.mrf.mxu2  ;;  %v898_v10 = vpop.f32.mrf.mxu3 }
 0x112   : > { %v909_v12 = vpop.f32.mrf.mxu0  ;;  %v922_v13 = vpop.f32.mrf.mxu1  ;;  %v511_v10 = vld [vmem:[#allocation2] sm:$0x3] }
 0x113   : > { %v910_v27 = vadd.f32 %v909_v12, %v897_v24 }
 0x115   : > { %v923_v28 = vadd.f32 %v922_v13, %v910_v27 }
 0x119   : > { %v935_v16 = vpop.f32.mrf.mxu2  ;;  %v948_v17 = vpop.f32.mrf.mxu3 }
 0x11a   : > { %v911_v18 = vpop.f32.mrf.mxu0  ;;  %v924_v19 = vpop.f32.mrf.mxu1  ;;  %v936_v31 = vadd.f32 %v935_v16, %v923_v28 }
 0x11c   : > { %v949_v34 = vadd.f32 %v948_v17, %v936_v31 }
 0x121   : > { %v937_v22 = vpop.f32.mrf.mxu2  ;;  %v950_v23 = vpop.f32.mrf.mxu3 }
 0x122   : > { %v961_v25 = vpop.f32.mrf.mxu0  ;;  %v974_v26 = vpop.f32.mrf.mxu1 }
 0x123   : > { %v962_v35 = vadd.f32 %v961_v25, %v949_v34 }
 0x125   : > { %v975_v40 = vadd.f32 %v974_v26, %v962_v35 }
 0x129   : > { %v987_v29 = vpop.f32.mrf.mxu2  ;;  %v1000_v30 = vpop.f32.mrf.mxu3 }
 0x12a   : > { %v963_v32 = vpop.f32.mrf.mxu0  ;;  %v976_v33 = vpop.f32.mrf.mxu1  ;;  %v988_v41 = vadd.f32 %v987_v29, %v975_v40 }
 0x12c   : > { %v1001_v44 = vadd.f32 %v1000_v30, %v988_v41 }
 0x131   : > { %v989_v36 = vpop.f32.mrf.mxu2  ;;  %v1002_v37 = vpop.f32.mrf.mxu3 }
 0x132   : > { %v1013_v38 = vpop.f32.mrf.mxu0  ;;  %v1026_v39 = vpop.f32.mrf.mxu1 }
 0x133   : > { %v1014_v47 = vadd.f32 %v1013_v38, %v1001_v44 }
 0x135   : > { %v1027_v48 = vadd.f32 %v1026_v39, %v1014_v47 }
 0x139   : > { %v1039_v42 = vpop.f32.mrf.mxu2  ;;  %v1052_v43 = vpop.f32.mrf.mxu3 }
 0x13a   : > { %v1015_v45 = vpop.f32.mrf.mxu0  ;;  %v1028_v46 = vpop.f32.mrf.mxu1  ;;  %v1040_v51 = vadd.f32 %v1039_v42, %v1027_v48 }
 0x13c   : > { %v1053_v54 = vadd.f32 %v1052_v43, %v1040_v51 }
 0x141   : > { %v1041_v49 = vpop.f32.mrf.mxu2  ;;  %v1054_v50 = vpop.f32.mrf.mxu3 }
 0x142   : > { %v1065_v52 = vpop.f32.mrf.mxu0  ;;  %v1078_v53 = vpop.f32.mrf.mxu1 }
 0x143   : > { %v1066_v55 = vadd.f32 %v1065_v52, %v1053_v54 }
 0x145   : > { %v1079_v60 = vadd.f32 %v1078_v53, %v1066_v55 }
 0x149   : > { %v1091_v56 = vpop.f32.mrf.mxu2  ;;  %v1104_v57 = vpop.f32.mrf.mxu3 }
 0x14a   : > { %v1067_v58 = vpop.f32.mrf.mxu0  ;;  %v1080_v59 = vpop.f32.mrf.mxu1  ;;  %v1092_v61 = vadd.f32 %v1091_v56, %v1079_v60 }
 0x14c   : > { %v1105_v0 = vadd.f32 %v1104_v57, %v1092_v61 }
 0x151   : > { %v1093_v62 = vpop.f32.mrf.mxu2  ;;  %v1106_v63 = vpop.f32.mrf.mxu3 }
 0x152   : > { %v1117_v1 = vpop.f32.mrf.mxu0  ;;  %v1130_v2 = vpop.f32.mrf.mxu1 }
 0x153   : > { %v1118_v3 = vadd.f32 %v1117_v1, %v1105_v0 }
 0x155   : > { %v1131_v4 = vadd.f32 %v1130_v2, %v1118_v3 }
 0x159   : > { %v1143_v5 = vpop.f32.mrf.mxu2  ;;  %v1156_v6 = vpop.f32.mrf.mxu3 }
 0x15a   : > { %v1144_v7 = vadd.f32 %v1143_v5, %v1131_v4  ;;  %v1119_v8 = vpop.f32.mrf.mxu0  ;;  %v1132_v9 = vpop.f32.mrf.mxu1 }
 0x15c   : > { %v1157_v11 = vadd.f32 %v1156_v6, %v1144_v7 }
 0x15d   : > { %1166 = sbr.rel (%p1463_p11) target bundleno = 627 (0x273), region = 63 }
 0x15e   : > { %v1160_v12 = vadd.f32 %v1157_v11, %v511_v10 }
 0x160   : > { %1162 = vst.msk [vmem:[#allocation2] sm:$0x3] %vm1161_vm1, %v1160_v12 }
 0x161   : > { %v1145_v13 = vpop.f32.mrf.mxu2  ;;  %v1158_v14 = vpop.f32.mrf.mxu3 }
 0x162   : > { %v1564_v16 = vld [vmem:[%s1964_s2] ss:$0 sm:$0xff] }
 0x167   : > { %v1167_v15 = vld [vmem:[#allocation2] sm:$0x3] }
 0x168   : > { %v1172_v17 = vadd.f32 %v1564_v16, %v1167_v15 }
 0x16a   : > { %v1174_v18 = vsel %vm1161_vm1, %v1172_v17, -inf  ;;  %1173 = vst.msk [vmem:[#allocation4] sm:$0x3] %vm1161_vm1, %v1172_v17 }
 0x16b   : > { %1175 = vmax.xlane.f32.xlu0 %v1174_v18 }
 0x1de   : > { %v1176_v19 = vpop.xlane.xlu0 %1175 }
 0x1df   : > { %v1177_v20 = vsub.f32 %v1172_v17, %v1176_v19 }
 0x1e1   : > { %v1178_v21 = vmul.f32 1.442695, %v1177_v20 }
 0x1e3   : > { %1565 = vpow2.f32 %v1178_v21 }
 0x1e9   : > { %v1566_v22 = vpop.eup %1565 }
 0x1ea   : > { %v1180_v23 = vsel %vm1161_vm1, %v1566_v22, 0.0 }
 0x1eb   : > { %1181 = vadd.xlane.f32.xlu0 %v1180_v23 }
 0x25e   : > { %v1182_v24 = vpop.xlane.xlu0 %1181 }
 0x25f   : > { %1567 = vrcp.f32 %v1182_v24  ;;  %v1194_v28 = vand.u32 2147483648, %v1182_v24  ;;  %v1192_v30 = vand.u32 2147483647, %v1182_v24  ;;  %vm1188_vm3 = vweird.f32 %v1182_v24 }
 0x261   : > { %v1195_v32 = vor.u32 1.1754944e-38, %v1194_v28  ;;  %vm1193_vm5 = vcmp.eq.f32.partialorder %v1192_v30, 8.507059e+37 }
 0x265   : > { %v1568_v25 = vpop.eup %1567 }
 0x266   : > { %v1184_v26 = vmul.f32 %v1568_v25, %v1182_v24  ;;  %vm1189_vm2 = vweird.f32 %v1568_v25 }
 0x267   : > { %vm1190_vm4 = vmor %vm1188_vm3, %vm1189_vm2 }
 0x268   : > { %v1185_v27 = vsub.f32 1.0, %v1184_v26 }
 0x26a   : > { %v1186_v29 = vmul.f32 %v1568_v25, %v1185_v27 }
 0x26c   : > { %v1187_v31 = vadd.f32 %v1568_v25, %v1186_v29 }
 0x26e   : > { %v1191_v33 = vsel %vm1190_vm4, %v1568_v25, %v1187_v31 }
 0x26f   : > { %v1196_v34 = vsel %vm1193_vm5, %v1195_v32, %v1191_v33 }
 0x270   : > { %v1197_v35 = vmul.f32 %v1566_v22, %v1196_v34 }
 0x272   : > { %1198 = vst.msk [vmem:[#allocation6] sm:$0x3] %vm1161_vm1, %v1197_v35 }
 0x273 PF: > { %p1925_p12 = scmp.eq.s32.totalorder %s1312_s20, 1  ;;  %s1209_s25 = sshll.u32 %s1965_s3, 4  ;;  %s1210_s25 = int_to_ptr.hbm [resolvable:$true] %s1209_s25 }
 0x274   : > { %s1674_s26 = smov [#allocation4]   ;;  %s1675_s28 = smov [#allocation6]  }
 0x275   : > { %s1207_s27 = sshll.u32 %s1674_s26, 4  ;;  %s1221_s29 = sshll.u32 %s1675_s28, 4  ;;  %s1208_s27 = int_to_ptr.vmem [resolvable:$true] %s1207_s27  ;;  %s1222_s29 = int_to_ptr.vmem [resolvable:$true] %s1221_s29 }
 0x276   : > { %1510 = dma.vmem_to_hbm [thread:$0]  (%p1925_p12), %s1208_s27, 32, %s1210_s25, [#allocation5]  }
 0x277   : > { %s1223_s5 = sshll.u32 %s1966_s4, 4  ;;  %s1224_s5 = int_to_ptr.hbm [resolvable:$true] %s1223_s5 }
 0x278   : > { %1512 = dma.vmem_to_hbm [thread:$0]  (%p1925_p12), %s1222_s29, 32, %s1224_s5, [#allocation7]  }
 0x279   : > { %1646 = dma.done.wait (%p1925_p12), [#allocation5], 32  }
 0x27a   : > { %1648 = vsyncadd (%p1925_p12), [#allocation5], 4294967264 }
 0x27b   : > { %1650 = dma.done.wait (%p1925_p12), [#allocation7], 32  }
 0x27c   : > { %1652 = vsyncadd (%p1925_p12), [#allocation7], 4294967264 }
 0x27d PF: > { %s17_s19 = sadd.s32 1, %s1671_s19   ;;  %s1968_s15 = smov %s1659_s16 }
 0x27e   : > { %p14_p13 = scmp.ge.s32.totalorder %s17_s19, 4   ;;  %s1969_s16 = smov %s1737_s24 }
 0x27f   : > { %s1970_s17 = smov %s1667_s18  ;;  %s1971_s18 = smov %s1973_s21 }
 0x280   :  { %16 = sbr.rel (!%p14_p13) target bundleno = 4 (0x4), region = 109 }
 0x285   :  { %1242 = vsyncpa [#allocation5], 1 }
 0x286   :  { %1244 = vsyncpa [#allocation5 + $0x1], 1 }
 0x287   :  { %1245 = vsyncpa [#allocation7], 1 }

</bundles_post_ra>
